<compile_context>
chip_gen: v6e
topology: v6e:2x2x1
jax: 0.10.0
libtpu: 0.0.40
codegen_flags: <defaults>
</compile_context>

<pallas_src>
import jax
import jax.numpy as jnp
from jax import lax
from jax.experimental import pallas as pl
from jax.experimental.pallas import tpu as pltpu


# ----------------------------- Pallas kernel --------------------------------
def rnn_model_kernel(ids_ref,    # (T*B, 1)  i32  time-major flattened token ids
                     msk_ref,    # (T*B, 4H) f32  packed-seq freeze mask (0/1), full width
                     emb_ref,    # (V, E)    f32  embedding table (padding row = 0)
                     wih_ref,    # (E, 4H)   f32  input->gates, i/f/o cols pre-scaled 0.5
                     whh_ref,    # (H, 4H)   f32  hidden->gates, i/f/o cols pre-scaled 0.5
                     b_ref,      # (1, 4H)   f32  (b_ih + b_hh), i/f/o cols pre-scaled 0.5
                     w1p_ref,    # (4H, 8)   f32  hidden Linear, rows >= H zero-padded
                     b1_ref,     # (1, 8)    f32
                     w2d_ref,    # (1, 8)    f32  w2[:,0] - w2[:,1]
                     b2d_ref,    # (1, 1)    f32  b2[0]   - b2[1]
                     hn_ref,     # out: (B, 4H) f32  wide final state (wrapper slices :H)
                     out_ref,    # out: (B, 2)  f32  log-softmax logits
                     gx_ref):    # scratch: (T*B, 4H) f32  precomputed input gates
    TB, H4 = gx_ref.shape
    H = H4 // 4
    V = emb_ref.shape[0]
    B = hn_ref.shape[0]
    T = TB // B

    # ---- fused embedding lookup + input projection (+ folded bias), off the serial chain
    # proj[v] = emb_table[v] @ w_ih + b ; gather all T*B rows with a one-hot matmul and
    # park the result in VMEM scratch so it is not held live across the unrolled loop.
    proj = jnp.dot(emb_ref[...], wih_ref[...],
                   preferred_element_type=jnp.float32) + b_ref[...]        # (V, 4H)
    vocab_iota = lax.broadcasted_iota(jnp.int32, (TB, V), 1)
    onehot = (ids_ref[...] == vocab_iota).astype(jnp.float32)              # (TB, V)
    gx_ref[...] = jnp.dot(onehot, proj, preferred_element_type=jnp.float32)

    w_hh = whh_ref[...]                                     # (H, 4H): K=32 contraction

    # Wide state: lanes [0,H) hold the true h/c; lanes [H,4H) carry bounded garbage that
    # never feeds the matmul (input is hw[:, :H]) nor the head (W1 pad rows are zero).
    hw = jnp.zeros((B, H4), jnp.float32)
    cw = jnp.zeros((B, H4), jnp.float32)

    # ---- LSTM recurrence, fully unrolled (T is static) ----
    for t in range(T):
        gates = gx_ref[pl.ds(t * B, B), :] + jnp.dot(
            hw[:, :H], w_hh, preferred_element_type=jnp.float32)           # (B, 4H)
        # Single EUP pass: i/f/o columns were pre-scaled by 0.5, so
        #   th = tanh(x/2) there  -> sigmoid(x) = 0.5*th + 0.5  (VPU affine)
        #   th = tanh(g)  in the g quarter (that quarter kept its original scale).
        th = jnp.tanh(gates)
        sig = 0.5 * th + 0.5
        # align f/g/o quarters into lanes [0,H) with XLU rotations (i is already there)
        f_al = pltpu.roll(sig, shift=3 * H, axis=1)
        g_al = pltpu.roll(th, shift=2 * H, axis=1)
        o_al = pltpu.roll(sig, shift=H, axis=1)
        c_new = f_al * cw + sig * g_al
        h_new = o_al * jnp.tanh(c_new)
        # packed-sequence freeze: exact blend with the precomputed 0/1 mask (no per-step
        # compare or broadcast emitted in the unroll).
        valid = msk_ref[pl.ds(t * B, B), :]                                 # (B, 4H)
        hw = hw + valid * (h_new - hw)
        cw = cw + valid * (c_new - cw)

    # lane-dense store of the wide state; the wrapper slices the true (B, H) h_n out.
    hn_ref[...] = hw

    # ---- MLP head: relu(hw @ W1pad + b1) -> 2-class log-softmax via one logit diff ----
    z1 = jnp.maximum(
        jnp.dot(hw, w1p_ref[...], preferred_element_type=jnp.float32) + b1_ref[...], 0.0)
    d = jnp.sum(z1 * w2d_ref[...], axis=1, keepdims=True) + b2d_ref[...]    # (B,1) z0-z1
    # log_softmax([z0, z1]) = [-softplus(-d), -softplus(d)]  (stable softplus)
    log_term = jnp.log(1.0 + jnp.exp(-jnp.abs(d)))
    sp_neg = jnp.maximum(-d, 0.0) + log_term                                # softplus(-d)
    sp_pos = jnp.maximum(d, 0.0) + log_term                                 # softplus(d)
    out_ref[...] = jnp.concatenate([-sp_neg, -sp_pos], axis=1)


# ------------------------------- wrapper -------------------------------------
@jax.jit
def rnn_model_forward(sequences, lengths, emb_table,
                      w_ih, w_hh, b_gates, w1, b1, w2, b2):
    B, T = sequences.shape
    H = w_hh.shape[0]
    H4 = 4 * H

    # Time-major flattened ids (row t*B + b == sequences[b, t]); gather happens in-kernel.
    ids_tm = jnp.transpose(sequences).reshape(T * B, 1).astype(jnp.int32)

    # Packed-sequence freeze mask, precomputed full width so the kernel's unrolled loop
    # emits no compare / broadcast.
    valid_bt = jnp.arange(T, dtype=jnp.int32)[None, :] < lengths.astype(jnp.int32)[:, None]
    valid_tm = jnp.transpose(valid_bt).astype(jnp.float32).reshape(T * B, 1)
    valid_wide = jnp.broadcast_to(valid_tm, (T * B, H4))

    # Single-tanh gate formulation: scale i/f/o columns by 0.5 (g columns untouched) so
    # one tanh(gates) gives tanh(x/2) for i/f/o and tanh(g) directly.
    col = jnp.arange(H4)
    scale = jnp.where((col >= 2 * H) & (col < 3 * H), 1.0, 0.5).astype(jnp.float32)[None, :]
    w_ih_s = (w_ih * scale).astype(jnp.float32)
    w_hh_s = (w_hh * scale).astype(jnp.float32)
    b_s = (b_gates * scale).astype(jnp.float32)

    # Zero-pad W1 rows to 4H so the head consumes the wide state without a lane slice.
    w1_pad = jnp.zeros((H4, w1.shape[1]), jnp.float32).at[:H, :].set(w1)

    # 2-class head reduced to a single logit difference.
    w2d = (w2[:, 0] - w2[:, 1]).reshape(1, -1).astype(jnp.float32)          # (1, 8)
    b2d = (b2[:, 0] - b2[:, 1]).reshape(1, 1).astype(jnp.float32)           # (1, 1)

    vmem = pl.BlockSpec(memory_space=pltpu.MemorySpace.VMEM)
    hn_wide, out = pl.pallas_call(
        rnn_model_kernel,
        out_shape=(jax.ShapeDtypeStruct((B, H4), jnp.float32),
                   jax.ShapeDtypeStruct((B, 2), jnp.float32)),
        in_specs=[vmem] * 10,
        out_specs=(vmem, vmem),
        scratch_shapes=[pltpu.VMEM((T * B, H4), jnp.float32)],
    )(ids_tm, valid_wide, emb_table, w_ih_s, w_hh_s, b_s, w1_pad, b1, w2d, b2d)
    return hn_wide[:, :H], out


# ----------------------- pure-JAX reference (for check) ----------------------
def reference_forward(sequences, lengths, emb_table,
                      w_ih, w_hh, b_gates, w1, b1, w2, b2):
    B, T = sequences.shape
    H = w_hh.shape[0]
    embs = jnp.take(emb_table, sequences, axis=0)             # (B, T, E)
    h = jnp.zeros((B, H), jnp.float32)
    c = jnp.zeros((B, H), jnp.float32)
    for t in range(T):
        x_t = embs[:, t, :]
        gates = x_t @ w_ih + h @ w_hh + b_gates
        i_g = jax.nn.sigmoid(gates[:, 0:H])
        f_g = jax.nn.sigmoid(gates[:, H:2 * H])
        g_g = jnp.tanh(gates[:, 2 * H:3 * H])
        o_g = jax.nn.sigmoid(gates[:, 3 * H:4 * H])
        c_new = f_g * c + i_g * g_g
        h_new = o_g * jnp.tanh(c_new)
        valid = (lengths.reshape(B, 1) > t)
        h = jnp.where(valid, h_new, h)
        c = jnp.where(valid, c_new, c)
    z1 = jax.nn.relu(h @ w1 + b1)
    z2 = z1 @ w2 + b2
    out = z2 - jax.scipy.special.logsumexp(z2, axis=-1, keepdims=True)
    return h, out


# --------------------------------- main ---------------------------------------
if __name__ == "__main__":
    # Model sizes (small, consistent with the module's __init__).
    VOCAB = 32          # vocabulary.count
    PAD = 0             # vocabulary.pad_token
    EMB = 16            # emb_dim
    HIDDEN = 32         # hidden_size
    B, T = 8, 10

    key = jax.random.PRNGKey(0)
    keys = jax.random.split(key, 10)

    # Deterministic parameter init (synthetic, not a checkpoint load).
    # NOTE: weights are stored (in_features, out_features) with gate order (i,f,g,o);
    # a real PyTorch checkpoint (weight_ih_l0 is (4H, E)) must be transposed accordingly.
    emb_table = 0.1 * jax.random.normal(keys[0], (VOCAB, EMB), jnp.float32)
    emb_table = emb_table.at[PAD].set(0.0)               # padding_idx row = 0

    w_ih = 0.1 * jax.random.normal(keys[1], (EMB, 4 * HIDDEN), jnp.float32)
    w_hh = 0.1 * jax.random.normal(keys[2], (HIDDEN, 4 * HIDDEN), jnp.float32)
    b_gates = (0.1 * jax.random.normal(keys[3], (1, 4 * HIDDEN), jnp.float32)
               + 0.1 * jax.random.normal(keys[4], (1, 4 * HIDDEN), jnp.float32))

    w1 = 0.1 * jax.random.normal(keys[5], (HIDDEN, 8), jnp.float32)
    b1 = 0.1 * jax.random.normal(keys[6], (1, 8), jnp.float32)
    w2 = 0.1 * jax.random.normal(keys[7], (8, 2), jnp.float32)
    b2 = 0.1 * jax.random.normal(keys[8], (1, 2), jnp.float32)

    # Inputs: token ids (padded with PAD) and descending lengths
    # (pack_padded_sequence default enforce_sorted=True).
    lengths = jnp.array([10, 9, 7, 7, 5, 4, 2, 1], dtype=jnp.int32)
    seqs = jax.random.randint(keys[9], (B, T), 1, VOCAB, dtype=jnp.int32)
    t_idx = jnp.arange(T)[None, :]
    seqs = jnp.where(t_idx < lengths[:, None], seqs, PAD)

    h_n, out = rnn_model_forward(seqs, lengths, emb_table,
                                 w_ih, w_hh, b_gates, w1, b1, w2, b2)
    jax.block_until_ready((h_n, out))

    h_ref, out_ref = reference_forward(seqs, lengths, emb_table,
                                       w_ih, w_hh, b_gates, w1, b1, w2, b2)
    assert jnp.allclose(h_n, h_ref, rtol=1e-3, atol=1e-3)
    assert jnp.allclose(out, out_ref, rtol=1e-3, atol=1e-3)

    print("KERNEL_OK")
</pallas_src>

<mosaic_0001>
module attributes {stable_mosaic.version = 11 : i64} {
  func.func @rnn_model_kernel(%arg0: memref<80x1xi32, #tpu.memory_space<vmem>>, %arg1: memref<80x128xf32, #tpu.memory_space<vmem>>, %arg2: memref<32x16xf32, #tpu.memory_space<vmem>>, %arg3: memref<16x128xf32, #tpu.memory_space<vmem>>, %arg4: memref<32x128xf32, #tpu.memory_space<vmem>>, %arg5: memref<1x128xf32, #tpu.memory_space<vmem>>, %arg6: memref<128x8xf32, #tpu.memory_space<vmem>>, %arg7: memref<1x8xf32, #tpu.memory_space<vmem>>, %arg8: memref<1x8xf32, #tpu.memory_space<vmem>>, %arg9: memref<1x1xf32, #tpu.memory_space<vmem>>, %arg10: memref<8x128xf32, #tpu.memory_space<vmem>>, %arg11: memref<8x2xf32, #tpu.memory_space<vmem>>, %arg12: memref<80x128xf32, #tpu.memory_space<vmem>>) attributes {dimension_semantics = [], scalar_prefetch = 0 : i64, scratch_operands = 1 : i64, tpu.core_type = #tpu.core_type<tc>} {
    %c0 = arith.constant 0 : index
    %c0_0 = arith.constant 0 : index
    %0 = vector.load %arg2[%c0, %c0_0] : memref<32x16xf32, #tpu.memory_space<vmem>>, vector<32x16xf32>
    %c0_1 = arith.constant 0 : index
    %c0_2 = arith.constant 0 : index
    %1 = vector.load %arg3[%c0_1, %c0_2] : memref<16x128xf32, #tpu.memory_space<vmem>>, vector<16x128xf32>
    %cst = arith.constant dense<0.000000e+00> : vector<32x128xf32>
    %2 = tpu.matmul %0, %1, %cst {dimension_numbers = #tpu.dot_dimension_numbers<[1], [0], [0], [1], [0, 0, 1, 1], [], []>} : vector<32x16xf32>, vector<16x128xf32>, vector<32x128xf32> -> vector<32x128xf32>
    %c0_3 = arith.constant 0 : index
    %c0_4 = arith.constant 0 : index
    %3 = vector.load %arg5[%c0_3, %c0_4] : memref<1x128xf32, #tpu.memory_space<vmem>>, vector<1x128xf32>
    %4 = vector.broadcast %3 : vector<1x128xf32> to vector<32x128xf32>
    %5 = arith.addf %2, %4 : vector<32x128xf32>
    %6 = tpu.iota {dimensions = array<i32: 1>} : vector<80x32xi32>
    %c0_5 = arith.constant 0 : index
    %c0_6 = arith.constant 0 : index
    %7 = vector.load %arg0[%c0_5, %c0_6] : memref<80x1xi32, #tpu.memory_space<vmem>>, vector<80x1xi32>
    %8 = vector.broadcast %7 : vector<80x1xi32> to vector<80x32xi32>
    %9 = arith.cmpi eq, %8, %6 : vector<80x32xi32>
    %10 = arith.extui %9 : vector<80x32xi1> to vector<80x32xi32>
    %11 = arith.sitofp %10 : vector<80x32xi32> to vector<80x32xf32>
    %cst_7 = arith.constant dense<0.000000e+00> : vector<80x128xf32>
    %12 = tpu.matmul %11, %5, %cst_7 {dimension_numbers = #tpu.dot_dimension_numbers<[1], [0], [0], [1], [0, 0, 1, 1], [], []>} : vector<80x32xf32>, vector<32x128xf32>, vector<80x128xf32> -> vector<80x128xf32>
    %c0_8 = arith.constant 0 : index
    %c0_9 = arith.constant 0 : index
    %13 = vector.load %arg12[%c0_8, %c0_9] : memref<80x128xf32, #tpu.memory_space<vmem>>, vector<80x128xf32>
    tpu.vector_store %arg12[%c0_8, %c0_9], %12 {strides = array<i32>} : memref<80x128xf32, #tpu.memory_space<vmem>>, vector<80x128xf32>,
    %c0_10 = arith.constant 0 : index
    %c0_11 = arith.constant 0 : index
    %14 = vector.load %arg4[%c0_10, %c0_11] : memref<32x128xf32, #tpu.memory_space<vmem>>, vector<32x128xf32>
    %cst_12 = arith.constant 0.000000e+00 : f32
    %15 = vector.broadcast %cst_12 : f32 to vector<8x128xf32>
    %cst_13 = arith.constant 0.000000e+00 : f32
    %16 = vector.broadcast %cst_13 : f32 to vector<8x128xf32>
    %c0_14 = arith.constant 0 : index
    %c0_15 = arith.constant 0 : index
    %17 = vector.load %arg12[%c0_14, %c0_15] : memref<80x128xf32, #tpu.memory_space<vmem>>, vector<8x128xf32>
    %18 = vector.extract_strided_slice %15 {offsets = [0, 0], sizes = [8, 32], strides = [1, 1]} : vector<8x128xf32> to vector<8x32xf32>
    %cst_16 = arith.constant dense<0.000000e+00> : vector<8x128xf32>
    %19 = tpu.matmul %18, %14, %cst_16 {dimension_numbers = #tpu.dot_dimension_numbers<[1], [0], [0], [1], [0, 0, 1, 1], [], []>} : vector<8x32xf32>, vector<32x128xf32>, vector<8x128xf32> -> vector<8x128xf32>
    %20 = arith.addf %17, %19 : vector<8x128xf32>
    %21 = math.tanh %20 : vector<8x128xf32>
    %cst_17 = arith.constant 5.000000e-01 : f32
    %22 = vector.broadcast %cst_17 : f32 to vector<8x128xf32>
    %23 = arith.mulf %22, %21 : vector<8x128xf32>
    %cst_18 = arith.constant 5.000000e-01 : f32
    %24 = vector.broadcast %cst_18 : f32 to vector<8x128xf32>
    %25 = arith.addf %23, %24 : vector<8x128xf32>
    %c96_i32 = arith.constant 96 : i32
    %26 = tpu.dynamic_rotate %25 by %c96_i32 dim 1 : vector<8x128xf32>, i32 -> vector<8x128xf32>
    %c64_i32 = arith.constant 64 : i32
    %27 = tpu.dynamic_rotate %21 by %c64_i32 dim 1 : vector<8x128xf32>, i32 -> vector<8x128xf32>
    %c32_i32 = arith.constant 32 : i32
    %28 = tpu.dynamic_rotate %25 by %c32_i32 dim 1 : vector<8x128xf32>, i32 -> vector<8x128xf32>
    %29 = arith.mulf %26, %16 : vector<8x128xf32>
    %30 = arith.mulf %25, %27 : vector<8x128xf32>
    %31 = arith.addf %29, %30 : vector<8x128xf32>
    %32 = math.tanh %31 : vector<8x128xf32>
    %33 = arith.mulf %28, %32 : vector<8x128xf32>
    %c0_19 = arith.constant 0 : index
    %c0_20 = arith.constant 0 : index
    %34 = vector.load %arg1[%c0_19, %c0_20] : memref<80x128xf32, #tpu.memory_space<vmem>>, vector<8x128xf32>
    %35 = arith.subf %33, %15 : vector<8x128xf32>
    %36 = arith.mulf %34, %35 : vector<8x128xf32>
    %37 = arith.addf %15, %36 : vector<8x128xf32>
    %38 = arith.subf %31, %16 : vector<8x128xf32>
    %39 = arith.mulf %34, %38 : vector<8x128xf32>
    %40 = arith.addf %16, %39 : vector<8x128xf32>
    %c8 = arith.constant 8 : index
    %c0_21 = arith.constant 0 : index
    %41 = vector.load %arg12[%c8, %c0_21] : memref<80x128xf32, #tpu.memory_space<vmem>>, vector<8x128xf32>
    %42 = vector.extract_strided_slice %37 {offsets = [0, 0], sizes = [8, 32], strides = [1, 1]} : vector<8x128xf32> to vector<8x32xf32>
    %cst_22 = arith.constant dense<0.000000e+00> : vector<8x128xf32>
    %43 = tpu.matmul %42, %14, %cst_22 {dimension_numbers = #tpu.dot_dimension_numbers<[1], [0], [0], [1], [0, 0, 1, 1], [], []>} : vector<8x32xf32>, vector<32x128xf32>, vector<8x128xf32> -> vector<8x128xf32>
    %44 = arith.addf %41, %43 : vector<8x128xf32>
    %45 = math.tanh %44 : vector<8x128xf32>
    %cst_23 = arith.constant 5.000000e-01 : f32
    %46 = vector.broadcast %cst_23 : f32 to vector<8x128xf32>
    %47 = arith.mulf %46, %45 : vector<8x128xf32>
    %cst_24 = arith.constant 5.000000e-01 : f32
    %48 = vector.broadcast %cst_24 : f32 to vector<8x128xf32>
    %49 = arith.addf %47, %48 : vector<8x128xf32>
    %c96_i32_25 = arith.constant 96 : i32
    %50 = tpu.dynamic_rotate %49 by %c96_i32_25 dim 1 : vector<8x128xf32>, i32 -> vector<8x128xf32>
    %c64_i32_26 = arith.constant 64 : i32
    %51 = tpu.dynamic_rotate %45 by %c64_i32_26 dim 1 : vector<8x128xf32>, i32 -> vector<8x128xf32>
    %c32_i32_27 = arith.constant 32 : i32
    %52 = tpu.dynamic_rotate %49 by %c32_i32_27 dim 1 : vector<8x128xf32>, i32 -> vector<8x128xf32>
    %53 = arith.mulf %50, %40 : vector<8x128xf32>
    %54 = arith.mulf %49, %51 : vector<8x128xf32>
    %55 = arith.addf %53, %54 : vector<8x128xf32>
    %56 = math.tanh %55 : vector<8x128xf32>
    %57 = arith.mulf %52, %56 : vector<8x128xf32>
    %c8_28 = arith.constant 8 : index
    %c0_29 = arith.constant 0 : index
    %58 = vector.load %arg1[%c8_28, %c0_29] : memref<80x128xf32, #tpu.memory_space<vmem>>, vector<8x128xf32>
    %59 = arith.subf %57, %37 : vector<8x128xf32>
    %60 = arith.mulf %58, %59 : vector<8x128xf32>
    %61 = arith.addf %37, %60 : vector<8x128xf32>
    %62 = arith.subf %55, %40 : vector<8x128xf32>
    %63 = arith.mulf %58, %62 : vector<8x128xf32>
    %64 = arith.addf %40, %63 : vector<8x128xf32>
    %c16 = arith.constant 16 : index
    %c0_30 = arith.constant 0 : index
    %65 = vector.load %arg12[%c16, %c0_30] : memref<80x128xf32, #tpu.memory_space<vmem>>, vector<8x128xf32>
    %66 = vector.extract_strided_slice %61 {offsets = [0, 0], sizes = [8, 32], strides = [1, 1]} : vector<8x128xf32> to vector<8x32xf32>
    %cst_31 = arith.constant dense<0.000000e+00> : vector<8x128xf32>
    %67 = tpu.matmul %66, %14, %cst_31 {dimension_numbers = #tpu.dot_dimension_numbers<[1], [0], [0], [1], [0, 0, 1, 1], [], []>} : vector<8x32xf32>, vector<32x128xf32>, vector<8x128xf32> -> vector<8x128xf32>
    %68 = arith.addf %65, %67 : vector<8x128xf32>
    %69 = math.tanh %68 : vector<8x128xf32>
    %cst_32 = arith.constant 5.000000e-01 : f32
    %70 = vector.broadcast %cst_32 : f32 to vector<8x128xf32>
    %71 = arith.mulf %70, %69 : vector<8x128xf32>
    %cst_33 = arith.constant 5.000000e-01 : f32
    %72 = vector.broadcast %cst_33 : f32 to vector<8x128xf32>
    %73 = arith.addf %71, %72 : vector<8x128xf32>
    %c96_i32_34 = arith.constant 96 : i32
    %74 = tpu.dynamic_rotate %73 by %c96_i32_34 dim 1 : vector<8x128xf32>, i32 -> vector<8x128xf32>
    %c64_i32_35 = arith.constant 64 : i32
    %75 = tpu.dynamic_rotate %69 by %c64_i32_35 dim 1 : vector<8x128xf32>, i32 -> vector<8x128xf32>
    %c32_i32_36 = arith.constant 32 : i32
    %76 = tpu.dynamic_rotate %73 by %c32_i32_36 dim 1 : vector<8x128xf32>, i32 -> vector<8x128xf32>
    %77 = arith.mulf %74, %64 : vector<8x128xf32>
    %78 = arith.mulf %73, %75 : vector<8x128xf32>
    %79 = arith.addf %77, %78 : vector<8x128xf32>
    %80 = math.tanh %79 : vector<8x128xf32>
    %81 = arith.mulf %76, %80 : vector<8x128xf32>
    %c16_37 = arith.constant 16 : index
    %c0_38 = arith.constant 0 : index
    %82 = vector.load %arg1[%c16_37, %c0_38] : memref<80x128xf32, #tpu.memory_space<vmem>>, vector<8x128xf32>
    %83 = arith.subf %81, %61 : vector<8x128xf32>
    %84 = arith.mulf %82, %83 : vector<8x128xf32>
    %85 = arith.addf %61, %84 : vector<8x128xf32>
    %86 = arith.subf %79, %64 : vector<8x128xf32>
    %87 = arith.mulf %82, %86 : vector<8x128xf32>
    %88 = arith.addf %64, %87 : vector<8x128xf32>
    %c24 = arith.constant 24 : index
    %c0_39 = arith.constant 0 : index
    %89 = vector.load %arg12[%c24, %c0_39] : memref<80x128xf32, #tpu.memory_space<vmem>>, vector<8x128xf32>
    %90 = vector.extract_strided_slice %85 {offsets = [0, 0], sizes = [8, 32], strides = [1, 1]} : vector<8x128xf32> to vector<8x32xf32>
    %cst_40 = arith.constant dense<0.000000e+00> : vector<8x128xf32>
    %91 = tpu.matmul %90, %14, %cst_40 {dimension_numbers = #tpu.dot_dimension_numbers<[1], [0], [0], [1], [0, 0, 1, 1], [], []>} : vector<8x32xf32>, vector<32x128xf32>, vector<8x128xf32> -> vector<8x128xf32>
    %92 = arith.addf %89, %91 : vector<8x128xf32>
    %93 = math.tanh %92 : vector<8x128xf32>
    %cst_41 = arith.constant 5.000000e-01 : f32
    %94 = vector.broadcast %cst_41 : f32 to vector<8x128xf32>
    %95 = arith.mulf %94, %93 : vector<8x128xf32>
    %cst_42 = arith.constant 5.000000e-01 : f32
    %96 = vector.broadcast %cst_42 : f32 to vector<8x128xf32>
    %97 = arith.addf %95, %96 : vector<8x128xf32>
    %c96_i32_43 = arith.constant 96 : i32
    %98 = tpu.dynamic_rotate %97 by %c96_i32_43 dim 1 : vector<8x128xf32>, i32 -> vector<8x128xf32>
    %c64_i32_44 = arith.constant 64 : i32
    %99 = tpu.dynamic_rotate %93 by %c64_i32_44 dim 1 : vector<8x128xf32>, i32 -> vector<8x128xf32>
    %c32_i32_45 = arith.constant 32 : i32
    %100 = tpu.dynamic_rotate %97 by %c32_i32_45 dim 1 : vector<8x128xf32>, i32 -> vector<8x128xf32>
    %101 = arith.mulf %98, %88 : vector<8x128xf32>
    %102 = arith.mulf %97, %99 : vector<8x128xf32>
    %103 = arith.addf %101, %102 : vector<8x128xf32>
    %104 = math.tanh %103 : vector<8x128xf32>
    %105 = arith.mulf %100, %104 : vector<8x128xf32>
    %c24_46 = arith.constant 24 : index
    %c0_47 = arith.constant 0 : index
    %106 = vector.load %arg1[%c24_46, %c0_47] : memref<80x128xf32, #tpu.memory_space<vmem>>, vector<8x128xf32>
    %107 = arith.subf %105, %85 : vector<8x128xf32>
    %108 = arith.mulf %106, %107 : vector<8x128xf32>
    %109 = arith.addf %85, %108 : vector<8x128xf32>
    %110 = arith.subf %103, %88 : vector<8x128xf32>
    %111 = arith.mulf %106, %110 : vector<8x128xf32>
    %112 = arith.addf %88, %111 : vector<8x128xf32>
    %c32 = arith.constant 32 : index
    %c0_48 = arith.constant 0 : index
    %113 = vector.load %arg12[%c32, %c0_48] : memref<80x128xf32, #tpu.memory_space<vmem>>, vector<8x128xf32>
    %114 = vector.extract_strided_slice %109 {offsets = [0, 0], sizes = [8, 32], strides = [1, 1]} : vector<8x128xf32> to vector<8x32xf32>
    %cst_49 = arith.constant dense<0.000000e+00> : vector<8x128xf32>
    %115 = tpu.matmul %114, %14, %cst_49 {dimension_numbers = #tpu.dot_dimension_numbers<[1], [0], [0], [1], [0, 0, 1, 1], [], []>} : vector<8x32xf32>, vector<32x128xf32>, vector<8x128xf32> -> vector<8x128xf32>
    %116 = arith.addf %113, %115 : vector<8x128xf32>
    %117 = math.tanh %116 : vector<8x128xf32>
    %cst_50 = arith.constant 5.000000e-01 : f32
    %118 = vector.broadcast %cst_50 : f32 to vector<8x128xf32>
    %119 = arith.mulf %118, %117 : vector<8x128xf32>
    %cst_51 = arith.constant 5.000000e-01 : f32
    %120 = vector.broadcast %cst_51 : f32 to vector<8x128xf32>
    %121 = arith.addf %119, %120 : vector<8x128xf32>
    %c96_i32_52 = arith.constant 96 : i32
    %122 = tpu.dynamic_rotate %121 by %c96_i32_52 dim 1 : vector<8x128xf32>, i32 -> vector<8x128xf32>
    %c64_i32_53 = arith.constant 64 : i32
    %123 = tpu.dynamic_rotate %117 by %c64_i32_53 dim 1 : vector<8x128xf32>, i32 -> vector<8x128xf32>
    %c32_i32_54 = arith.constant 32 : i32
    %124 = tpu.dynamic_rotate %121 by %c32_i32_54 dim 1 : vector<8x128xf32>, i32 -> vector<8x128xf32>
    %125 = arith.mulf %122, %112 : vector<8x128xf32>
    %126 = arith.mulf %121, %123 : vector<8x128xf32>
    %127 = arith.addf %125, %126 : vector<8x128xf32>
    %128 = math.tanh %127 : vector<8x128xf32>
    %129 = arith.mulf %124, %128 : vector<8x128xf32>
    %c32_55 = arith.constant 32 : index
    %c0_56 = arith.constant 0 : index
    %130 = vector.load %arg1[%c32_55, %c0_56] : memref<80x128xf32, #tpu.memory_space<vmem>>, vector<8x128xf32>
    %131 = arith.subf %129, %109 : vector<8x128xf32>
    %132 = arith.mulf %130, %131 : vector<8x128xf32>
    %133 = arith.addf %109, %132 : vector<8x128xf32>
    %134 = arith.subf %127, %112 : vector<8x128xf32>
    %135 = arith.mulf %130, %134 : vector<8x128xf32>
    %136 = arith.addf %112, %135 : vector<8x128xf32>
    %c40 = arith.constant 40 : index
    %c0_57 = arith.constant 0 : index
    %137 = vector.load %arg12[%c40, %c0_57] : memref<80x128xf32, #tpu.memory_space<vmem>>, vector<8x128xf32>
    %138 = vector.extract_strided_slice %133 {offsets = [0, 0], sizes = [8, 32], strides = [1, 1]} : vector<8x128xf32> to vector<8x32xf32>
    %cst_58 = arith.constant dense<0.000000e+00> : vector<8x128xf32>
    %139 = tpu.matmul %138, %14, %cst_58 {dimension_numbers = #tpu.dot_dimension_numbers<[1], [0], [0], [1], [0, 0, 1, 1], [], []>} : vector<8x32xf32>, vector<32x128xf32>, vector<8x128xf32> -> vector<8x128xf32>
    %140 = arith.addf %137, %139 : vector<8x128xf32>
    %141 = math.tanh %140 : vector<8x128xf32>
    %cst_59 = arith.constant 5.000000e-01 : f32
    %142 = vector.broadcast %cst_59 : f32 to vector<8x128xf32>
    %143 = arith.mulf %142, %141 : vector<8x128xf32>
    %cst_60 = arith.constant 5.000000e-01 : f32
    %144 = vector.broadcast %cst_60 : f32 to vector<8x128xf32>
    %145 = arith.addf %143, %144 : vector<8x128xf32>
    %c96_i32_61 = arith.constant 96 : i32
    %146 = tpu.dynamic_rotate %145 by %c96_i32_61 dim 1 : vector<8x128xf32>, i32 -> vector<8x128xf32>
    %c64_i32_62 = arith.constant 64 : i32
    %147 = tpu.dynamic_rotate %141 by %c64_i32_62 dim 1 : vector<8x128xf32>, i32 -> vector<8x128xf32>
    %c32_i32_63 = arith.constant 32 : i32
    %148 = tpu.dynamic_rotate %145 by %c32_i32_63 dim 1 : vector<8x128xf32>, i32 -> vector<8x128xf32>
    %149 = arith.mulf %146, %136 : vector<8x128xf32>
    %150 = arith.mulf %145, %147 : vector<8x128xf32>
    %151 = arith.addf %149, %150 : vector<8x128xf32>
    %152 = math.tanh %151 : vector<8x128xf32>
    %153 = arith.mulf %148, %152 : vector<8x128xf32>
    %c40_64 = arith.constant 40 : index
    %c0_65 = arith.constant 0 : index
    %154 = vector.load %arg1[%c40_64, %c0_65] : memref<80x128xf32, #tpu.memory_space<vmem>>, vector<8x128xf32>
    %155 = arith.subf %153, %133 : vector<8x128xf32>
    %156 = arith.mulf %154, %155 : vector<8x128xf32>
    %157 = arith.addf %133, %156 : vector<8x128xf32>
    %158 = arith.subf %151, %136 : vector<8x128xf32>
    %159 = arith.mulf %154, %158 : vector<8x128xf32>
    %160 = arith.addf %136, %159 : vector<8x128xf32>
    %c48 = arith.constant 48 : index
    %c0_66 = arith.constant 0 : index
    %161 = vector.load %arg12[%c48, %c0_66] : memref<80x128xf32, #tpu.memory_space<vmem>>, vector<8x128xf32>
    %162 = vector.extract_strided_slice %157 {offsets = [0, 0], sizes = [8, 32], strides = [1, 1]} : vector<8x128xf32> to vector<8x32xf32>
    %cst_67 = arith.constant dense<0.000000e+00> : vector<8x128xf32>
    %163 = tpu.matmul %162, %14, %cst_67 {dimension_numbers = #tpu.dot_dimension_numbers<[1], [0], [0], [1], [0, 0, 1, 1], [], []>} : vector<8x32xf32>, vector<32x128xf32>, vector<8x128xf32> -> vector<8x128xf32>
    %164 = arith.addf %161, %163 : vector<8x128xf32>
    %165 = math.tanh %164 : vector<8x128xf32>
    %cst_68 = arith.constant 5.000000e-01 : f32
    %166 = vector.broadcast %cst_68 : f32 to vector<8x128xf32>
    %167 = arith.mulf %166, %165 : vector<8x128xf32>
    %cst_69 = arith.constant 5.000000e-01 : f32
    %168 = vector.broadcast %cst_69 : f32 to vector<8x128xf32>
    %169 = arith.addf %167, %168 : vector<8x128xf32>
    %c96_i32_70 = arith.constant 96 : i32
    %170 = tpu.dynamic_rotate %169 by %c96_i32_70 dim 1 : vector<8x128xf32>, i32 -> vector<8x128xf32>
    %c64_i32_71 = arith.constant 64 : i32
    %171 = tpu.dynamic_rotate %165 by %c64_i32_71 dim 1 : vector<8x128xf32>, i32 -> vector<8x128xf32>
    %c32_i32_72 = arith.constant 32 : i32
    %172 = tpu.dynamic_rotate %169 by %c32_i32_72 dim 1 : vector<8x128xf32>, i32 -> vector<8x128xf32>
    %173 = arith.mulf %170, %160 : vector<8x128xf32>
    %174 = arith.mulf %169, %171 : vector<8x128xf32>
    %175 = arith.addf %173, %174 : vector<8x128xf32>
    %176 = math.tanh %175 : vector<8x128xf32>
    %177 = arith.mulf %172, %176 : vector<8x128xf32>
    %c48_73 = arith.constant 48 : index
    %c0_74 = arith.constant 0 : index
    %178 = vector.load %arg1[%c48_73, %c0_74] : memref<80x128xf32, #tpu.memory_space<vmem>>, vector<8x128xf32>
    %179 = arith.subf %177, %157 : vector<8x128xf32>
    %180 = arith.mulf %178, %179 : vector<8x128xf32>
    %181 = arith.addf %157, %180 : vector<8x128xf32>
    %182 = arith.subf %175, %160 : vector<8x128xf32>
    %183 = arith.mulf %178, %182 : vector<8x128xf32>
    %184 = arith.addf %160, %183 : vector<8x128xf32>
    %c56 = arith.constant 56 : index
    %c0_75 = arith.constant 0 : index
    %185 = vector.load %arg12[%c56, %c0_75] : memref<80x128xf32, #tpu.memory_space<vmem>>, vector<8x128xf32>
    %186 = vector.extract_strided_slice %181 {offsets = [0, 0], sizes = [8, 32], strides = [1, 1]} : vector<8x128xf32> to vector<8x32xf32>
    %cst_76 = arith.constant dense<0.000000e+00> : vector<8x128xf32>
    %187 = tpu.matmul %186, %14, %cst_76 {dimension_numbers = #tpu.dot_dimension_numbers<[1], [0], [0], [1], [0, 0, 1, 1], [], []>} : vector<8x32xf32>, vector<32x128xf32>, vector<8x128xf32> -> vector<8x128xf32>
    %188 = arith.addf %185, %187 : vector<8x128xf32>
    %189 = math.tanh %188 : vector<8x128xf32>
    %cst_77 = arith.constant 5.000000e-01 : f32
    %190 = vector.broadcast %cst_77 : f32 to vector<8x128xf32>
    %191 = arith.mulf %190, %189 : vector<8x128xf32>
    %cst_78 = arith.constant 5.000000e-01 : f32
    %192 = vector.broadcast %cst_78 : f32 to vector<8x128xf32>
    %193 = arith.addf %191, %192 : vector<8x128xf32>
    %c96_i32_79 = arith.constant 96 : i32
    %194 = tpu.dynamic_rotate %193 by %c96_i32_79 dim 1 : vector<8x128xf32>, i32 -> vector<8x128xf32>
    %c64_i32_80 = arith.constant 64 : i32
    %195 = tpu.dynamic_rotate %189 by %c64_i32_80 dim 1 : vector<8x128xf32>, i32 -> vector<8x128xf32>
    %c32_i32_81 = arith.constant 32 : i32
    %196 = tpu.dynamic_rotate %193 by %c32_i32_81 dim 1 : vector<8x128xf32>, i32 -> vector<8x128xf32>
    %197 = arith.mulf %194, %184 : vector<8x128xf32>
    %198 = arith.mulf %193, %195 : vector<8x128xf32>
    %199 = arith.addf %197, %198 : vector<8x128xf32>
    %200 = math.tanh %199 : vector<8x128xf32>
    %201 = arith.mulf %196, %200 : vector<8x128xf32>
    %c56_82 = arith.constant 56 : index
    %c0_83 = arith.constant 0 : index
    %202 = vector.load %arg1[%c56_82, %c0_83] : memref<80x128xf32, #tpu.memory_space<vmem>>, vector<8x128xf32>
    %203 = arith.subf %201, %181 : vector<8x128xf32>
    %204 = arith.mulf %202, %203 : vector<8x128xf32>
    %205 = arith.addf %181, %204 : vector<8x128xf32>
    %206 = arith.subf %199, %184 : vector<8x128xf32>
    %207 = arith.mulf %202, %206 : vector<8x128xf32>
    %208 = arith.addf %184, %207 : vector<8x128xf32>
    %c64 = arith.constant 64 : index
    %c0_84 = arith.constant 0 : index
    %209 = vector.load %arg12[%c64, %c0_84] : memref<80x128xf32, #tpu.memory_space<vmem>>, vector<8x128xf32>
    %210 = vector.extract_strided_slice %205 {offsets = [0, 0], sizes = [8, 32], strides = [1, 1]} : vector<8x128xf32> to vector<8x32xf32>
    %cst_85 = arith.constant dense<0.000000e+00> : vector<8x128xf32>
    %211 = tpu.matmul %210, %14, %cst_85 {dimension_numbers = #tpu.dot_dimension_numbers<[1], [0], [0], [1], [0, 0, 1, 1], [], []>} : vector<8x32xf32>, vector<32x128xf32>, vector<8x128xf32> -> vector<8x128xf32>
    %212 = arith.addf %209, %211 : vector<8x128xf32>
    %213 = math.tanh %212 : vector<8x128xf32>
    %cst_86 = arith.constant 5.000000e-01 : f32
    %214 = vector.broadcast %cst_86 : f32 to vector<8x128xf32>
    %215 = arith.mulf %214, %213 : vector<8x128xf32>
    %cst_87 = arith.constant 5.000000e-01 : f32
    %216 = vector.broadcast %cst_87 : f32 to vector<8x128xf32>
    %217 = arith.addf %215, %216 : vector<8x128xf32>
    %c96_i32_88 = arith.constant 96 : i32
    %218 = tpu.dynamic_rotate %217 by %c96_i32_88 dim 1 : vector<8x128xf32>, i32 -> vector<8x128xf32>
    %c64_i32_89 = arith.constant 64 : i32
    %219 = tpu.dynamic_rotate %213 by %c64_i32_89 dim 1 : vector<8x128xf32>, i32 -> vector<8x128xf32>
    %c32_i32_90 = arith.constant 32 : i32
    %220 = tpu.dynamic_rotate %217 by %c32_i32_90 dim 1 : vector<8x128xf32>, i32 -> vector<8x128xf32>
    %221 = arith.mulf %218, %208 : vector<8x128xf32>
    %222 = arith.mulf %217, %219 : vector<8x128xf32>
    %223 = arith.addf %221, %222 : vector<8x128xf32>
    %224 = math.tanh %223 : vector<8x128xf32>
    %225 = arith.mulf %220, %224 : vector<8x128xf32>
    %c64_91 = arith.constant 64 : index
    %c0_92 = arith.constant 0 : index
    %226 = vector.load %arg1[%c64_91, %c0_92] : memref<80x128xf32, #tpu.memory_space<vmem>>, vector<8x128xf32>
    %227 = arith.subf %225, %205 : vector<8x128xf32>
    %228 = arith.mulf %226, %227 : vector<8x128xf32>
    %229 = arith.addf %205, %228 : vector<8x128xf32>
    %230 = arith.subf %223, %208 : vector<8x128xf32>
    %231 = arith.mulf %226, %230 : vector<8x128xf32>
    %232 = arith.addf %208, %231 : vector<8x128xf32>
    %c72 = arith.constant 72 : index
    %c0_93 = arith.constant 0 : index
    %233 = vector.load %arg12[%c72, %c0_93] : memref<80x128xf32, #tpu.memory_space<vmem>>, vector<8x128xf32>
    %234 = vector.extract_strided_slice %229 {offsets = [0, 0], sizes = [8, 32], strides = [1, 1]} : vector<8x128xf32> to vector<8x32xf32>
    %cst_94 = arith.constant dense<0.000000e+00> : vector<8x128xf32>
    %235 = tpu.matmul %234, %14, %cst_94 {dimension_numbers = #tpu.dot_dimension_numbers<[1], [0], [0], [1], [0, 0, 1, 1], [], []>} : vector<8x32xf32>, vector<32x128xf32>, vector<8x128xf32> -> vector<8x128xf32>
    %236 = arith.addf %233, %235 : vector<8x128xf32>
    %237 = math.tanh %236 : vector<8x128xf32>
    %cst_95 = arith.constant 5.000000e-01 : f32
    %238 = vector.broadcast %cst_95 : f32 to vector<8x128xf32>
    %239 = arith.mulf %238, %237 : vector<8x128xf32>
    %cst_96 = arith.constant 5.000000e-01 : f32
    %240 = vector.broadcast %cst_96 : f32 to vector<8x128xf32>
    %241 = arith.addf %239, %240 : vector<8x128xf32>
    %c96_i32_97 = arith.constant 96 : i32
    %242 = tpu.dynamic_rotate %241 by %c96_i32_97 dim 1 : vector<8x128xf32>, i32 -> vector<8x128xf32>
    %c64_i32_98 = arith.constant 64 : i32
    %243 = tpu.dynamic_rotate %237 by %c64_i32_98 dim 1 : vector<8x128xf32>, i32 -> vector<8x128xf32>
    %c32_i32_99 = arith.constant 32 : i32
    %244 = tpu.dynamic_rotate %241 by %c32_i32_99 dim 1 : vector<8x128xf32>, i32 -> vector<8x128xf32>
    %245 = arith.mulf %242, %232 : vector<8x128xf32>
    %246 = arith.mulf %241, %243 : vector<8x128xf32>
    %247 = arith.addf %245, %246 : vector<8x128xf32>
    %248 = math.tanh %247 : vector<8x128xf32>
    %249 = arith.mulf %244, %248 : vector<8x128xf32>
    %c72_100 = arith.constant 72 : index
    %c0_101 = arith.constant 0 : index
    %250 = vector.load %arg1[%c72_100, %c0_101] : memref<80x128xf32, #tpu.memory_space<vmem>>, vector<8x128xf32>
    %251 = arith.subf %249, %229 : vector<8x128xf32>
    %252 = arith.mulf %250, %251 : vector<8x128xf32>
    %253 = arith.addf %229, %252 : vector<8x128xf32>
    %c0_102 = arith.constant 0 : index
    %c0_103 = arith.constant 0 : index
    %254 = vector.load %arg10[%c0_102, %c0_103] : memref<8x128xf32, #tpu.memory_space<vmem>>, vector<8x128xf32>
    tpu.vector_store %arg10[%c0_102, %c0_103], %253 {strides = array<i32>} : memref<8x128xf32, #tpu.memory_space<vmem>>, vector<8x128xf32>,
    %c0_104 = arith.constant 0 : index
    %c0_105 = arith.constant 0 : index
    %255 = vector.load %arg6[%c0_104, %c0_105] : memref<128x8xf32, #tpu.memory_space<vmem>>, vector<128x8xf32>
    %cst_106 = arith.constant dense<0.000000e+00> : vector<8x8xf32>
    %256 = tpu.matmul %253, %255, %cst_106 {dimension_numbers = #tpu.dot_dimension_numbers<[1], [0], [0], [1], [0, 0, 1, 1], [], []>} : vector<8x128xf32>, vector<128x8xf32>, vector<8x8xf32> -> vector<8x8xf32>
    %c0_107 = arith.constant 0 : index
    %c0_108 = arith.constant 0 : index
    %257 = vector.load %arg7[%c0_107, %c0_108] : memref<1x8xf32, #tpu.memory_space<vmem>>, vector<1x8xf32>
    %258 = vector.broadcast %257 : vector<1x8xf32> to vector<8x8xf32>
    %259 = arith.addf %256, %258 : vector<8x8xf32>
    %cst_109 = arith.constant 0.000000e+00 : f32
    %260 = vector.broadcast %cst_109 : f32 to vector<8x8xf32>
    %261 = arith.maximumf %259, %260 : vector<8x8xf32>
    %c0_110 = arith.constant 0 : index
    %c0_111 = arith.constant 0 : index
    %262 = vector.load %arg8[%c0_110, %c0_111] : memref<1x8xf32, #tpu.memory_space<vmem>>, vector<1x8xf32>
    %263 = vector.broadcast %262 : vector<1x8xf32> to vector<8x8xf32>
    %264 = arith.mulf %261, %263 : vector<8x8xf32>
    %cst_112 = arith.constant dense<0.000000e+00> : vector<8xf32>
    %265 = vector.multi_reduction <add>, %264, %cst_112 [1] : vector<8x8xf32> to vector<8xf32>
    %266 = vector.shape_cast %265 : vector<8xf32> to vector<8x1xf32>
    %c0_113 = arith.constant 0 : index
    %c0_114 = arith.constant 0 : index
    %267 = vector.load %arg9[%c0_113, %c0_114] : memref<1x1xf32, #tpu.memory_space<vmem>>, vector<1x1xf32>
    %268 = vector.broadcast %267 : vector<1x1xf32> to vector<8x1xf32>
    %269 = arith.addf %266, %268 : vector<8x1xf32>
    %270 = math.absf %269 : vector<8x1xf32>
    %cst_115 = arith.constant 0.000000e+00 : f32
    %271 = vector.broadcast %cst_115 : f32 to vector<8x1xf32>
    %272 = arith.subf %271, %270 : vector<8x1xf32>
    %273 = math.exp %272 : vector<8x1xf32>
    %cst_116 = arith.constant 1.000000e+00 : f32
    %274 = vector.broadcast %cst_116 : f32 to vector<8x1xf32>
    %275 = arith.addf %274, %273 : vector<8x1xf32>
    %276 = math.log %275 : vector<8x1xf32>
    %cst_117 = arith.constant 0.000000e+00 : f32
    %277 = vector.broadcast %cst_117 : f32 to vector<8x1xf32>
    %278 = arith.subf %277, %269 : vector<8x1xf32>
    %cst_118 = arith.constant 0.000000e+00 : f32
    %279 = vector.broadcast %cst_118 : f32 to vector<8x1xf32>
    %280 = arith.maximumf %278, %279 : vector<8x1xf32>
    %281 = arith.addf %280, %276 : vector<8x1xf32>
    %cst_119 = arith.constant 0.000000e+00 : f32
    %282 = vector.broadcast %cst_119 : f32 to vector<8x1xf32>
    %283 = arith.maximumf %269, %282 : vector<8x1xf32>
    %284 = arith.addf %283, %276 : vector<8x1xf32>
    %cst_120 = arith.constant 0.000000e+00 : f32
    %285 = vector.broadcast %cst_120 : f32 to vector<8x1xf32>
    %286 = arith.subf %285, %281 : vector<8x1xf32>
    %cst_121 = arith.constant 0.000000e+00 : f32
    %287 = vector.broadcast %cst_121 : f32 to vector<8x1xf32>
    %288 = arith.subf %287, %284 : vector<8x1xf32>
    %289 = tpu.concatenate %286, %288 in 1 : vector<8x1xf32>, vector<8x1xf32> -> vector<8x2xf32>
    %c0_122 = arith.constant 0 : index
    %c0_123 = arith.constant 0 : index
    %290 = vector.load %arg11[%c0_122, %c0_123] : memref<8x2xf32, #tpu.memory_space<vmem>>, vector<8x2xf32>
    tpu.vector_store %arg11[%c0_122, %c0_123], %289 {strides = array<i32>} : memref<8x2xf32, #tpu.memory_space<vmem>>, vector<8x2xf32>,
    return
  }
}

</mosaic_0001>

<bundles_post_ra>
// kernel: rnn_model_forward.1
= control target key start
LH: loop header
LB: loop body
LE: loop exit
PB: predicated region body
PF: predicated region fallthrough
CT: control target
= control target key end

     0   :  { %s2329_s0 = inlined_call_operand.vmem [shape: s32[80,1], index: 0, kind: input, shape index: {}]   ;;  %s2330_s1 = inlined_call_operand.vmem [shape: f32[80,128], index: 1, kind: input, shape index: {}]   ;;  %s2331_s2 = inlined_call_operand.vmem [shape: f32[32,16], index: 2, kind: input, shape index: {}]   ;;  %s2332_s3 = inlined_call_operand.vmem [shape: f32[16,128], index: 3, kind: input, shape index: {}]   ;;  %s2333_s4 = inlined_call_operand.vmem [shape: f32[32,128], index: 4, kind: input, shape index: {}]   ;;  %s2334_s5 = inlined_call_operand.vmem [shape: f32[1,128], index: 5, kind: input, shape index: {}]   ;;  %s2335_s6 = inlined_call_operand.vmem [shape: f32[128,8], index: 6, kind: input, shape index: {}]   ;;  %s2336_s7 = inlined_call_operand.vmem [shape: f32[1,8], index: 7, kind: input, shape index: {}]   ;;  %s2337_s8 = inlined_call_operand.vmem [shape: f32[1,8], index: 8, kind: input, shape index: {}]   ;;  %s2338_s9 = inlined_call_operand.<no memory space> [shape: f32[1,1], index: 9, kind: input, shape index: {}]   ;;  %s2339_s10 = inlined_call_operand.hbm [shape: f32[8,128], index: 10, kind: output, shape index: {0}]   ;;  %s2340_s11 = inlined_call_operand.vmem [shape: f32[8,2], index: 11, kind: output, shape index: {1}]  }
   0x1   :  { %v17_v0 = vstv %s2338_s9 }
   0x2   :  { %18 = vst [vmem:[#allocation3] sm:$0x1] %v17_v0 }
   0x3   :  { %v45_v1 = vld [vmem:[%s2332_s3 + $0x8] sm:$0xff]  ;;  %v44_v2 = vld [vmem:[%s2332_s3] sm:$0xff]  ;;  %vm53_vm0 = vcmask 130048   ;;  %v1871_v5 = vmov 0   ;;  %v155_v7 = vld [vmem:[%s2329_s0 + $0x10] sm:$0xff] }
   0x4   :  { %v40_v3 = vld [vmem:[%s2331_s2] sm:$0xff]  ;;  %1617 = vmatprep.subr.mxu0 %v45_v1  ;;  %v41_v4 = vld [vmem:[%s2331_s2 + $0x8] sm:$0xff]  ;;  %1803 = vset.pattern.permute.xlu0 %v1871_v5  ;;  %v42_v8 = vld [vmem:[%s2331_s2 + $0x10] sm:$0xff] }
   0x5   :  { %1621 = vmatprep.mubr.msk.f32.mxu0 %vm53_vm0, %v40_v3  ;;  %1618 = vmatpush3.msra.mxu0 %v45_v1  ;;  %v153_v6 = vld [vmem:[%s2329_s0] sm:$0xff]  ;;  %v154_v9 = vld [vmem:[%s2329_s0 + $0x8] sm:$0xff] }
   0x6   :  { %1619 = vmatprep.subr.mxu0 %v44_v2  ;;  %164 = vperm.xlu0 %1803, %v153_v6  }
   0x7   :  { %1620 = vmatpush3.msra.mxu0 %v44_v2  ;;  %1804 = vset.pattern.permute.xlu1 %v1871_v5 }
   0x8   :  { %1622 = vmatmul.mubr.msk.f32.vlgmr.msra.gmra.mxu0 %vm53_vm0, %v41_v4  ;;  %170 = vperm.xlu1 %1804, %v155_v7  }
   0x9   :  { %19 = vsyncpa [#allocation5], 0  ;;  %1624 = vmatprep.mubr.msk.f32.mxu0 %vm53_vm0, %v42_v8  ;;  %v43_v10 = vld [vmem:[%s2331_s2 + $0x18] sm:$0xff]  ;;  %v1872_v12 = vmov 0.0   ;;  %v157_v13 = vld [vmem:[%s2329_s0 + $0x20] sm:$0xff]  ;;  %vm1873_vm1 = vmmov 0   ;;  %v151_v23 = vlaneseq }
   0xa   :  { %v156_v11 = vld [vmem:[%s2329_s0 + $0x18] sm:$0xff]  ;;  %1672 = vmatprep.subr.mxu0 %v1872_v12  ;;  %167 = vperm.xlu0 %1803, %v154_v9   ;;  %v158_v14 = vld [vmem:[%s2329_s0 + $0x28] sm:$0xff]  ;;  %v159_v15 = vld [vmem:[%s2329_s0 + $0x30] sm:$0xff]  ;;  %vm223_vm2 = vcmask 261120   ;;  %s1875_s16 = smov 96   ;;  %s1876_s17 = smov 32  }
   0xb   :  { %v160_v16 = vld [vmem:[%s2329_s0 + $0x38] sm:$0xff]  ;;  %v161_v17 = vld [vmem:[%s2329_s0 + $0x40] sm:$0xff]  ;;  %v162_v18 = vld [vmem:[%s2329_s0 + $0x48] sm:$0xff]  ;;  %v2025_v24 = vand.u32 127, %v151_v23  ;;  %vm1441_vm13 = vcmask 64512  }
   0xc   :  { %1625 = vmatmul.mubr.msk.f32.gmra.mxu0 %vm53_vm0, %v43_v10  ;;  %173 = vperm.xlu1 %1804, %v156_v11   ;;  %v1998_v19 = vld [vmem:[%s2333_s4 + $0x18] sm:$0xff]  ;;  %v2005_v20 = vld [vmem:[%s2333_s4 + $0x10] sm:$0xff]  ;;  %v2012_v21 = vld [vmem:[%s2333_s4 + $0x8] sm:$0xff] }
   0xd   :  { %1673 = vmatpush3.msra.mxu0 %v1998_v19  ;;  %v2019_v22 = vld [vmem:[%s2333_s4] sm:$0xff]  ;;  %1680 = vmatprep.mubr.msk.f32.mxu0 %vm1873_vm1, %v1872_v12 }
   0xe   :  { %176 = vperm.xlu0 %1803, %v157_v13   ;;  %1674 = vmatprep.subr.mxu0 %v1872_v12  ;;  %v1493_v31 = vld [vmem:[%s2334_s5] ss:$0 sm:$0xff]  ;;  %s1874_s5 = smov 64  }
   0xf   :  { %1675 = vmatpush3.msra.mxu0 %v2005_v20  ;;  %v472_v10 = vld [vmem:[%s2330_s1] sm:$0xff] }
  0x10   :  { %179 = vperm.xlu1 %1804, %v158_v14   ;;  %1676 = vmatprep.subr.mxu0 %v1872_v12 }
  0x11   :  { %1677 = vmatpush3.msra.mxu0 %v2012_v21 }
  0x12   :  { %182 = vperm.xlu0 %1803, %v159_v15   ;;  %1678 = vmatprep.subr.mxu0 %v1872_v12 }
  0x13   :  { %1679 = vmatpush3.msra.mxu0 %v2019_v22 }
  0x14   :  { %185 = vperm.xlu1 %1804, %v160_v16   ;;  %1694 = vmatprep.subr.mxu0 %v1872_v12 }
  0x16   :  { %188 = vperm.xlu0 %1803, %v161_v17  }
  0x18   :  { %191 = vperm.xlu1 %1804, %v162_v18  }
  0x81   :  { %v165_v25 = vpop.permute.xlu0 %164 }
  0x82   :  { %vm193_vm3 = vcmp.eq.s32.totalorder %v165_v25, %v2025_v24 }
  0x83   :  { %v1498_v26 = vsel %vm193_vm3, 1.0, %v1872_v12  ;;  %v171_v27 = vpop.permute.xlu1 %170 }
  0x84   :  { %1635 = vmatprep.mubr.msk.f32.mxu1 %vm223_vm2, %v1498_v26  ;;  %vm195_vm4 = vcmp.eq.s32.totalorder %v171_v27, %v2025_v24 }
  0x85   :  { %v168_v30 = vpop.permute.xlu0 %167  ;;  %v1500_v41 = vsel %vm195_vm4, 1.0, %v1872_v12 }
  0x86   :  { %vm194_vm5 = vcmp.eq.s32.totalorder %v168_v30, %v2025_v24 }
  0x87   :  { %v174_v34 = vpop.permute.xlu1 %173  ;;  %v1499_v42 = vsel %vm194_vm5, 1.0, %v1872_v12 }
  0x88   :  { %vm196_vm6 = vcmp.eq.s32.totalorder %v174_v34, %v2025_v24 }
  0x89   :  { %v177_v38 = vpop.permute.xlu0 %176  ;;  %v1501_v44 = vsel %vm196_vm6, 1.0, %v1872_v12 }
  0x8a   :  { %vm197_vm7 = vcmp.eq.s32.totalorder %v177_v38, %v2025_v24 }
  0x8b   :  { %v180_v40 = vpop.permute.xlu1 %179  ;;  %v1502_v46 = vsel %vm197_vm7, 1.0, %v1872_v12 }
  0x8c   :  { %vm198_vm8 = vcmp.eq.s32.totalorder %v180_v40, %v2025_v24 }
  0x8d   :  { %v183_v43 = vpop.permute.xlu0 %182  ;;  %v1503_v48 = vsel %vm198_vm8, 1.0, %v1872_v12 }
  0x8e   :  { %vm199_vm9 = vcmp.eq.s32.totalorder %v183_v43, %v2025_v24 }
  0x8f   :  { %v186_v45 = vpop.permute.xlu1 %185  ;;  %v1504_v49 = vsel %vm199_vm9, 1.0, %v1872_v12 }
  0x90   :  { %vm200_vm10 = vcmp.eq.s32.totalorder %v186_v45, %v2025_v24 }
  0x91   :  { %v189_v47 = vpop.permute.xlu0 %188  ;;  %v1505_v51 = vsel %vm200_vm10, 1.0, %v1872_v12 }
  0x92   :  { %vm201_vm11 = vcmp.eq.s32.totalorder %v189_v47, %v2025_v24 }
  0x93   :  { %v192_v50 = vpop.permute.xlu1 %191  ;;  %v1506_v52 = vsel %vm201_vm11, 1.0, %v1872_v12 }
  0x94   :  { %vm202_vm12 = vcmp.eq.s32.totalorder %v192_v50, %v2025_v24 }
  0x95   :  { %v1507_v53 = vsel %vm202_vm12, 1.0, %v1872_v12 }
  0xc8   :  { %v1623_v28 = vpop.f32.mrf.mxu0 }
  0xc9   :  { %v138_v37 = vadd.f32 %v1623_v28, %v1493_v31 }
  0xca   :  { %v132_v29 = vpop.f32.mrf.mxu0 }
  0xcb   :  { %v133_v39 = vadd.f32 %v1493_v31, %v132_v29 }
  0xcc   :  { %v1626_v32 = vpop.f32.mrf.mxu0 }
  0xcd   :  { %v148_v33 = vadd.f32 %v1626_v32, %v1493_v31 }
  0xce   :  { %v142_v35 = vpop.f32.mrf.mxu0 }
  0xcf   :  { %v143_v36 = vadd.f32 %v1493_v31, %v142_v35  ;;  %1627 = vmatprep.subr.mxu1 %v148_v33 }
  0xd0   :  { %1628 = vmatpush3.msra.mxu1 %v148_v33  ;;  %v566_v33 = vld [vmem:[%s2330_s1 + $0x8] sm:$0xff] }
  0xd1   :  { %1629 = vmatprep.subr.mxu1 %v143_v36 }
  0xd2   :  { %1630 = vmatpush3.msra.mxu1 %v143_v36 }
  0xd3   :  { %1631 = vmatprep.subr.mxu1 %v138_v37 }
  0xd4   :  { %1632 = vmatpush3.msra.mxu1 %v138_v37 }
  0xd5   :  { %1633 = vmatprep.subr.mxu1 %v133_v39 }
  0xd6   :  { %1634 = vmatpush3.msra.mxu1 %v133_v39 }
  0xd7   :  { %1636 = vmatmul.mubr.msk.f32.vlgmr.msra.gmra.mxu1 %vm223_vm2, %v1499_v42  ;;  %1650 = vmatprep.subr.mxu1 %v1872_v12 }
  0xd8   :  { %1638 = vmatprep.mubr.msk.f32.mxu1 %vm223_vm2, %v1500_v41  ;;  %1651 = vmatpush3.msra.mxu1 %v1998_v19 }
  0xd9   :  { %1652 = vmatprep.subr.mxu1 %v1872_v12 }
  0xda   :  { %1653 = vmatpush3.msra.mxu1 %v2005_v20 }
  0xdb   :  { %1639 = vmatmul.mubr.msk.f32.gmra.mxu1 %vm223_vm2, %v1501_v44  ;;  %1654 = vmatprep.subr.mxu1 %v1872_v12 }
  0xdc   :  { %1641 = vmatprep.mubr.msk.f32.mxu1 %vm223_vm2, %v1502_v46  ;;  %1655 = vmatpush3.msra.mxu1 %v2012_v21 }
  0xdd   :  { %1656 = vmatprep.subr.mxu1 %v1872_v12 }
  0xde   :  { %1657 = vmatpush3.msra.mxu1 %v2019_v22 }
  0xdf   :  { %1642 = vmatmul.mubr.msk.f32.gmra.mxu1 %vm223_vm2, %v1503_v48  ;;  %1661 = vmatprep.subr.mxu1 %v1872_v12 }
  0xe0   :  { %1644 = vmatprep.mubr.msk.f32.mxu1 %vm223_vm2, %v1504_v49 }
  0xe3   :  { %1645 = vmatmul.mubr.msk.f32.gmra.mxu1 %vm223_vm2, %v1505_v51 }
  0xe4   :  { %1647 = vmatprep.mubr.msk.f32.mxu1 %vm223_vm2, %v1506_v52 }
  0xe7   :  { %1648 = vmatmul.mubr.msk.f32.gmra.mxu1 %vm223_vm2, %v1507_v53 }
  0xe8   :  { %1658 = vmatprep.mubr.msk.f32.mxu1 %vm1873_vm1, %v1872_v12 }
  0xeb   :  { %1659 = vmatmul.mubr.f32.vlgmr.msra.gmra.mxu1 %v1872_v12 }
  0xec   :  { %1662 = vmatpush3.msra.mxu1 %v1998_v19  ;;  %1669 = vmatprep.mubr.msk.f32.mxu1 %vm1873_vm1, %v1872_v12 }
  0xed   :  { %1663 = vmatprep.subr.mxu1 %v1872_v12 }
  0xee   :  { %1664 = vmatpush3.msra.mxu1 %v2005_v20 }
  0xef   :  { %1665 = vmatprep.subr.mxu1 %v1872_v12 }
  0xf0   :  { %1666 = vmatpush3.msra.mxu1 %v2012_v21 }
  0xf1   :  { %1667 = vmatprep.subr.mxu1 %v1872_v12 }
  0xf2   :  { %1668 = vmatpush3.msra.mxu1 %v2019_v22 }
  0xf3   :  { %1683 = vmatprep.subr.mxu1 %v1872_v12 }
 0x197   :  { %v1637_v54 = vpop.f32.mrf.mxu1 }
 0x199   :  { %v320_v55 = vpop.f32.mrf.mxu1 }
 0x19b   :  { %v2082_v56 = vpop.f32.mrf.mxu1 }
 0x19d   :  { %v2084_v57 = vpop.f32.mrf.mxu1 }
 0x19f   :  { %v2086_v58 = vpop.f32.mrf.mxu1 }
 0x1a1   :  { %v2088_v59 = vpop.f32.mrf.mxu1 }
 0x1a3   :  { %v2090_v60 = vpop.f32.mrf.mxu1 }
 0x1a5   :  { %v2092_v61 = vpop.f32.mrf.mxu1 }
 0x1a7   :  { %v2094_v62 = vpop.f32.mrf.mxu1 }
 0x1a9   :  { %v2096_v63 = vpop.f32.mrf.mxu1 }
 0x1ab   :  { %v453_v0 = vpop.f32.mrf.mxu1 }
 0x1ac   :  { %v457_v1 = vadd.f32 %v453_v0, %v320_v55 }
 0x1ad   :  { %v1660_v2 = vpop.f32.mrf.mxu1 }
 0x1ae   :  { %1805 = vtanh.f32 %v457_v1 }
 0x1bb   :  { %v1806_v3 = vpop.eup %1805 }
 0x1bc   :  { %463 = vrot.lane.b32.xlu1 %v1806_v3, %s1874_s5  ;;  %v459_v4 = vmul.f32 0.5, %v1806_v3 }
 0x1be   :  { %v460_v5 = vadd.f32 0.5, %v459_v4 }
 0x1c0   :  { %461 = vrot.lane.b32.xlu0 %v460_v5, %s1875_s16 }
 0x1c4   :  { %465 = vrot.lane.b32.xlu0 %v460_v5, %s1876_s17 }
 0x22e   :  { %v464_v6 = vpop.permute.xlu1 %463 }
 0x22f   :  { %v468_v8 = vmul.f32 %v464_v6, %v460_v5 }
 0x232   :  { %v462_v7 = vpop.permute.xlu0 %461 }
 0x233   :  { %v467_v9 = vmul.f32 0.0, %v462_v7 }
 0x235   :  { %v469_v11 = vadd.f32 %v468_v8, %v467_v9 }
 0x236   :  { %v466_v15 = vpop.permute.xlu0 %465 }
 0x237   :  { %1807 = vtanh.f32 %v469_v11  ;;  %v475_v13 = vmul.f32 %v472_v10, %v469_v11 }
 0x244   :  { %v1808_v14 = vpop.eup %1807 }
 0x245   :  { %v471_v16 = vmul.f32 %v1808_v14, %v466_v15 }
 0x247   :  { %v473_v17 = vmul.f32 %v472_v10, %v471_v16 }
 0x249   :  { %1670 = vmatmul.mubr.msk.f32.vlgmr.msra.gmra.mxu1 %vm223_vm2, %v473_v17 }
 0x24a   :  { %1684 = vmatpush3.msra.mxu1 %v1998_v19  ;;  %1691 = vmatprep.mubr.msk.f32.mxu1 %vm1873_vm1, %v1872_v12 }
 0x24b   :  { %1685 = vmatprep.subr.mxu1 %v1872_v12 }
 0x24c   :  { %1686 = vmatpush3.msra.mxu1 %v2005_v20 }
 0x24d   :  { %1687 = vmatprep.subr.mxu1 %v1872_v12 }
 0x24e   :  { %1688 = vmatpush3.msra.mxu1 %v2012_v21 }
 0x24f   :  { %1689 = vmatprep.subr.mxu1 %v1872_v12 }
 0x250   :  { %1690 = vmatpush3.msra.mxu1 %v2019_v22 }
 0x251   :  { %1705 = vmatprep.subr.mxu1 %v1872_v12 }
 0x309   :  { %v547_v18 = vpop.f32.mrf.mxu1 }
 0x30a   :  { %v551_v23 = vadd.f32 %v1637_v54, %v547_v18  ;;  %v662_v54 = vld [vmem:[%s2330_s1 + $0x10] sm:$0xff] }
 0x30b   :  { %v1671_v24 = vpop.f32.mrf.mxu1 }
 0x30c   :  { %1809 = vtanh.f32 %v551_v23 }
 0x319   :  { %v1810_v25 = vpop.eup %1809 }
 0x31a   :  { %557 = vrot.lane.b32.xlu0 %v1810_v25, %s1874_s5  ;;  %v553_v26 = vmul.f32 0.5, %v1810_v25 }
 0x31c   :  { %v554_v27 = vadd.f32 0.5, %v553_v26 }
 0x31e   :  { %555 = vrot.lane.b32.xlu1 %v554_v27, %s1875_s16 }
 0x322   :  { %559 = vrot.lane.b32.xlu1 %v554_v27, %s1876_s17 }
 0x38c   :  { %v558_v28 = vpop.permute.xlu0 %557 }
 0x38d   :  { %v562_v30 = vmul.f32 %v558_v28, %v554_v27 }
 0x390   :  { %v556_v29 = vpop.permute.xlu1 %555 }
 0x391   :  { %v561_v31 = vmul.f32 %v556_v29, %v475_v13 }
 0x393   :  { %v563_v32 = vadd.f32 %v562_v30, %v561_v31 }
 0x394   :  { %v560_v38 = vpop.permute.xlu1 %559 }
 0x395   :  { %1811 = vtanh.f32 %v563_v32  ;;  %v570_v34 = vsub.f32 %v563_v32, %v475_v13 }
 0x397   :  { %v571_v35 = vmul.f32 %v570_v34, %v566_v33 }
 0x399   :  { %v572_v36 = vadd.f32 %v571_v35, %v475_v13 }
 0x3a2   :  { %v1812_v37 = vpop.eup %1811 }
 0x3a3   :  { %v565_v39 = vmul.f32 %v1812_v37, %v560_v38 }
 0x3a5   :  { %v567_v40 = vsub.f32 %v565_v39, %v473_v17 }
 0x3a7   :  { %v568_v41 = vmul.f32 %v567_v40, %v566_v33 }
 0x3a9   :  { %v569_v42 = vadd.f32 %v568_v41, %v473_v17 }
 0x3ab   :  { %1681 = vmatmul.mubr.msk.f32.vlgmr.msra.gmra.mxu0 %vm223_vm2, %v569_v42 }
 0x3ac   :  { %1695 = vmatpush3.msra.mxu0 %v1998_v19  ;;  %1702 = vmatprep.mubr.msk.f32.mxu0 %vm1873_vm1, %v1872_v12 }
 0x3ad   :  { %1696 = vmatprep.subr.mxu0 %v1872_v12 }
 0x3ae   :  { %1697 = vmatpush3.msra.mxu0 %v2005_v20 }
 0x3af   :  { %1698 = vmatprep.subr.mxu0 %v1872_v12 }
 0x3b0   :  { %1699 = vmatpush3.msra.mxu0 %v2012_v21 }
 0x3b1   :  { %1700 = vmatprep.subr.mxu0 %v1872_v12 }
 0x3b2   :  { %1701 = vmatpush3.msra.mxu0 %v2019_v22 }
 0x3b3   :  { %1716 = vmatprep.subr.mxu0 %v1872_v12 }
 0x46b   :  { %v643_v43 = vpop.f32.mrf.mxu0 }
 0x46c   :  { %v647_v44 = vadd.f32 %v643_v43, %v2084_v57 }
 0x46d   :  { %v1682_v45 = vpop.f32.mrf.mxu0 }
 0x46e   :  { %1813 = vtanh.f32 %v647_v44 }
 0x47b   :  { %v1814_v46 = vpop.eup %1813 }
 0x47c   :  { %653 = vrot.lane.b32.xlu1 %v1814_v46, %s1874_s5  ;;  %v649_v47 = vmul.f32 0.5, %v1814_v46 }
 0x47e   :  { %v650_v48 = vadd.f32 0.5, %v649_v47 }
 0x480   :  { %651 = vrot.lane.b32.xlu0 %v650_v48, %s1875_s16 }
 0x484   :  { %655 = vrot.lane.b32.xlu0 %v650_v48, %s1876_s17 }
 0x4ee   :  { %v654_v49 = vpop.permute.xlu1 %653 }
 0x4ef   :  { %v658_v51 = vmul.f32 %v654_v49, %v650_v48 }
 0x4f2   :  { %v652_v50 = vpop.permute.xlu0 %651 }
 0x4f3   :  { %v657_v52 = vmul.f32 %v652_v50, %v572_v36 }
 0x4f5   :  { %v659_v53 = vadd.f32 %v658_v51, %v657_v52 }
 0x4f6   :  { %v656_v2 = vpop.permute.xlu0 %655 }
 0x4f7   :  { %1815 = vtanh.f32 %v659_v53  ;;  %v666_v55 = vsub.f32 %v659_v53, %v572_v36 }
 0x4f9   :  { %v667_v57 = vmul.f32 %v666_v55, %v662_v54 }
 0x4fb   :  { %v668_v0 = vadd.f32 %v667_v57, %v572_v36 }
 0x504   :  { %v1816_v1 = vpop.eup %1815 }
 0x505   :  { %v661_v3 = vmul.f32 %v1816_v1, %v656_v2 }
 0x507   :  { %v663_v4 = vsub.f32 %v661_v3, %v569_v42 }
 0x509   :  { %v664_v5 = vmul.f32 %v663_v4, %v662_v54 }
 0x50b   :  { %v665_v6 = vadd.f32 %v664_v5, %v569_v42 }
 0x50d   :  { %1692 = vmatmul.mubr.msk.f32.vlgmr.msra.gmra.mxu1 %vm223_vm2, %v665_v6 }
 0x50e   :  { %1706 = vmatpush3.msra.mxu1 %v1998_v19  ;;  %1713 = vmatprep.mubr.msk.f32.mxu1 %vm1873_vm1, %v1872_v12 }
 0x50f   :  { %1707 = vmatprep.subr.mxu1 %v1872_v12 }
 0x510   :  { %1708 = vmatpush3.msra.mxu1 %v2005_v20 }
 0x511   :  { %1709 = vmatprep.subr.mxu1 %v1872_v12 }
 0x512   :  { %1710 = vmatpush3.msra.mxu1 %v2012_v21 }
 0x513   :  { %1711 = vmatprep.subr.mxu1 %v1872_v12 }
 0x514   :  { %1712 = vmatpush3.msra.mxu1 %v2019_v22 }
 0x515   :  { %1727 = vmatprep.subr.mxu1 %v1872_v12 }
 0x5cd   :  { %v739_v7 = vpop.f32.mrf.mxu1 }
 0x5ce   :  { %v743_v8 = vadd.f32 %v2082_v56, %v739_v7  ;;  %v758_v56 = vld [vmem:[%s2330_s1 + $0x18] sm:$0xff] }
 0x5cf   :  { %v1693_v9 = vpop.f32.mrf.mxu1 }
 0x5d0   :  { %1817 = vtanh.f32 %v743_v8 }
 0x5dd   :  { %v1818_v10 = vpop.eup %1817 }
 0x5de   :  { %749 = vrot.lane.b32.xlu0 %v1818_v10, %s1874_s5  ;;  %v745_v11 = vmul.f32 0.5, %v1818_v10 }
 0x5e0   :  { %v746_v13 = vadd.f32 0.5, %v745_v11 }
 0x5e2   :  { %747 = vrot.lane.b32.xlu1 %v746_v13, %s1875_s16 }
 0x5e6   :  { %751 = vrot.lane.b32.xlu1 %v746_v13, %s1876_s17 }
 0x650   :  { %v750_v14 = vpop.permute.xlu0 %749 }
 0x651   :  { %v754_v16 = vmul.f32 %v750_v14, %v746_v13 }
 0x654   :  { %v748_v15 = vpop.permute.xlu1 %747 }
 0x655   :  { %v753_v17 = vmul.f32 %v748_v15, %v668_v0 }
 0x657   :  { %v755_v18 = vadd.f32 %v754_v16, %v753_v17 }
 0x658   :  { %v752_v27 = vpop.permute.xlu1 %751 }
 0x659   :  { %1819 = vtanh.f32 %v755_v18  ;;  %v762_v23 = vsub.f32 %v755_v18, %v668_v0 }
 0x65b   :  { %v763_v24 = vmul.f32 %v762_v23, %v758_v56 }
 0x65d   :  { %v764_v25 = vadd.f32 %v763_v24, %v668_v0 }
 0x666   :  { %v1820_v26 = vpop.eup %1819 }
 0x667   :  { %v757_v28 = vmul.f32 %v1820_v26, %v752_v27 }
 0x669   :  { %v759_v29 = vsub.f32 %v757_v28, %v665_v6 }
 0x66b   :  { %v760_v30 = vmul.f32 %v759_v29, %v758_v56 }
 0x66d   :  { %v761_v31 = vadd.f32 %v760_v30, %v665_v6 }
 0x66f   :  { %1703 = vmatmul.mubr.msk.f32.vlgmr.msra.gmra.mxu0 %vm223_vm2, %v761_v31 }
 0x670   :  { %1717 = vmatpush3.msra.mxu0 %v1998_v19  ;;  %1724 = vmatprep.mubr.msk.f32.mxu0 %vm1873_vm1, %v1872_v12 }
 0x671   :  { %1718 = vmatprep.subr.mxu0 %v1872_v12 }
 0x672   :  { %1719 = vmatpush3.msra.mxu0 %v2005_v20 }
 0x673   :  { %1720 = vmatprep.subr.mxu0 %v1872_v12 }
 0x674   :  { %1721 = vmatpush3.msra.mxu0 %v2012_v21 }
 0x675   :  { %1722 = vmatprep.subr.mxu0 %v1872_v12 }
 0x676   :  { %1723 = vmatpush3.msra.mxu0 %v2019_v22 }
 0x677   :  { %1738 = vmatprep.subr.mxu0 %v1872_v12 }
 0x72f   :  { %v835_v32 = vpop.f32.mrf.mxu0 }
 0x730   :  { %v839_v33 = vadd.f32 %v835_v32, %v2088_v59  ;;  %v854_v59 = vld [vmem:[%s2330_s1 + $0x20] sm:$0xff] }
 0x731   :  { %v1704_v34 = vpop.f32.mrf.mxu0 }
 0x732   :  { %1821 = vtanh.f32 %v839_v33 }
 0x73f   :  { %v1822_v35 = vpop.eup %1821 }
 0x740   :  { %845 = vrot.lane.b32.xlu1 %v1822_v35, %s1874_s5  ;;  %v841_v36 = vmul.f32 0.5, %v1822_v35 }
 0x742   :  { %v842_v37 = vadd.f32 0.5, %v841_v36 }
 0x744   :  { %843 = vrot.lane.b32.xlu0 %v842_v37, %s1875_s16 }
 0x748   :  { %847 = vrot.lane.b32.xlu0 %v842_v37, %s1876_s17 }
 0x7b2   :  { %v846_v38 = vpop.permute.xlu1 %845 }
 0x7b3   :  { %v850_v40 = vmul.f32 %v846_v38, %v842_v37 }
 0x7b6   :  { %v844_v39 = vpop.permute.xlu0 %843 }
 0x7b7   :  { %v849_v41 = vmul.f32 %v844_v39, %v764_v25 }
 0x7b9   :  { %v851_v42 = vadd.f32 %v850_v40, %v849_v41 }
 0x7ba   :  { %v848_v47 = vpop.permute.xlu0 %847 }
 0x7bb   :  { %1823 = vtanh.f32 %v851_v42  ;;  %v858_v43 = vsub.f32 %v851_v42, %v764_v25 }
 0x7bd   :  { %v859_v44 = vmul.f32 %v858_v43, %v854_v59 }
 0x7bf   :  { %v860_v45 = vadd.f32 %v859_v44, %v764_v25 }
 0x7c8   :  { %v1824_v46 = vpop.eup %1823 }
 0x7c9   :  { %v853_v48 = vmul.f32 %v1824_v46, %v848_v47 }
 0x7cb   :  { %v855_v49 = vsub.f32 %v853_v48, %v761_v31 }
 0x7cd   :  { %v856_v50 = vmul.f32 %v855_v49, %v854_v59 }
 0x7cf   :  { %v857_v51 = vadd.f32 %v856_v50, %v761_v31 }
 0x7d1   :  { %1714 = vmatmul.mubr.msk.f32.vlgmr.msra.gmra.mxu1 %vm223_vm2, %v857_v51 }
 0x7d2   :  { %1728 = vmatpush3.msra.mxu1 %v1998_v19  ;;  %1735 = vmatprep.mubr.msk.f32.mxu1 %vm1873_vm1, %v1872_v12 }
 0x7d3   :  { %1729 = vmatprep.subr.mxu1 %v1872_v12 }
 0x7d4   :  { %1730 = vmatpush3.msra.mxu1 %v2005_v20 }
 0x7d5   :  { %1731 = vmatprep.subr.mxu1 %v1872_v12 }
 0x7d6   :  { %1732 = vmatpush3.msra.mxu1 %v2012_v21 }
 0x7d7   :  { %1733 = vmatprep.subr.mxu1 %v1872_v12 }
 0x7d8   :  { %1734 = vmatpush3.msra.mxu1 %v2019_v22 }
 0x7d9   :  { %1749 = vmatprep.subr.mxu1 %v1872_v12 }
 0x891   :  { %v931_v52 = vpop.f32.mrf.mxu1 }
 0x892   :  { %v935_v53 = vadd.f32 %v2086_v58, %v931_v52  ;;  %v950_v58 = vld [vmem:[%s2330_s1 + $0x28] sm:$0xff] }
 0x893   :  { %v1715_v54 = vpop.f32.mrf.mxu1 }
 0x894   :  { %1825 = vtanh.f32 %v935_v53 }
 0x8a1   :  { %v1826_v55 = vpop.eup %1825 }
 0x8a2   :  { %941 = vrot.lane.b32.xlu0 %v1826_v55, %s1874_s5  ;;  %v937_v57 = vmul.f32 0.5, %v1826_v55 }
 0x8a4   :  { %v938_v0 = vadd.f32 0.5, %v937_v57 }
 0x8a6   :  { %939 = vrot.lane.b32.xlu1 %v938_v0, %s1875_s16 }
 0x8aa   :  { %943 = vrot.lane.b32.xlu1 %v938_v0, %s1876_s17 }
 0x914   :  { %v942_v1 = vpop.permute.xlu0 %941 }
 0x915   :  { %v946_v3 = vmul.f32 %v942_v1, %v938_v0 }
 0x918   :  { %v940_v2 = vpop.permute.xlu1 %939 }
 0x919   :  { %v945_v4 = vmul.f32 %v940_v2, %v860_v45 }
 0x91b   :  { %v947_v5 = vadd.f32 %v946_v3, %v945_v4 }
 0x91c   :  { %v944_v10 = vpop.permute.xlu1 %943 }
 0x91d   :  { %1827 = vtanh.f32 %v947_v5  ;;  %v954_v6 = vsub.f32 %v947_v5, %v860_v45 }
 0x91f   :  { %v955_v7 = vmul.f32 %v954_v6, %v950_v58 }
 0x921   :  { %v956_v8 = vadd.f32 %v955_v7, %v860_v45 }
 0x92a   :  { %v1828_v9 = vpop.eup %1827 }
 0x92b   :  { %v949_v11 = vmul.f32 %v1828_v9, %v944_v10 }
 0x92d   :  { %v951_v13 = vsub.f32 %v949_v11, %v857_v51 }
 0x92f   :  { %v952_v14 = vmul.f32 %v951_v13, %v950_v58 }
 0x931   :  { %v953_v15 = vadd.f32 %v952_v14, %v857_v51 }
 0x933   :  { %1725 = vmatmul.mubr.msk.f32.vlgmr.msra.gmra.mxu0 %vm223_vm2, %v953_v15 }
 0x934   :  { %1739 = vmatpush3.msra.mxu0 %v1998_v19  ;;  %1746 = vmatprep.mubr.msk.f32.mxu0 %vm1873_vm1, %v1872_v12 }
 0x935   :  { %1740 = vmatprep.subr.mxu0 %v1872_v12 }
 0x936   :  { %1741 = vmatpush3.msra.mxu0 %v2005_v20 }
 0x937   :  { %1742 = vmatprep.subr.mxu0 %v1872_v12 }
 0x938   :  { %1743 = vmatpush3.msra.mxu0 %v2012_v21 }
 0x939   :  { %1744 = vmatprep.subr.mxu0 %v1872_v12 }
 0x93a   :  { %1745 = vmatpush3.msra.mxu0 %v2019_v22 }
 0x93b   :  { %1760 = vmatprep.subr.mxu0 %v1872_v12 }
 0x9f3   :  { %v1027_v16 = vpop.f32.mrf.mxu0 }
 0x9f4   :  { %v1031_v17 = vadd.f32 %v1027_v16, %v2092_v61  ;;  %v1046_v61 = vld [vmem:[%s2330_s1 + $0x30] sm:$0xff] }
 0x9f5   :  { %v1726_v18 = vpop.f32.mrf.mxu0 }
 0x9f6   :  { %1829 = vtanh.f32 %v1031_v17  ;;  %v1354_v17 = vld [vmem:[%s2335_s6 + $0x78] sm:$0xff] }
 0xa03   :  { %v1830_v56 = vpop.eup %1829 }
 0xa04   :  { %1037 = vrot.lane.b32.xlu1 %v1830_v56, %s1874_s5  ;;  %v1033_v23 = vmul.f32 0.5, %v1830_v56 }
 0xa06   :  { %v1034_v24 = vadd.f32 0.5, %v1033_v23 }
 0xa08   :  { %1035 = vrot.lane.b32.xlu0 %v1034_v24, %s1875_s16 }
 0xa0c   :  { %1039 = vrot.lane.b32.xlu0 %v1034_v24, %s1876_s17 }
 0xa76   :  { %v1038_v25 = vpop.permute.xlu1 %1037 }
 0xa77   :  { %v1042_v27 = vmul.f32 %v1038_v25, %v1034_v24  ;;  %v1353_v24 = vld [vmem:[%s2335_s6 + $0x70] sm:$0xff]  ;;  %v1352_v25 = vld [vmem:[%s2335_s6 + $0x68] sm:$0xff] }
 0xa7a   :  { %v1036_v26 = vpop.permute.xlu0 %1035 }
 0xa7b   :  { %v1041_v28 = vmul.f32 %v1036_v26, %v956_v8  ;;  %v1350_v26 = vld [vmem:[%s2335_s6 + $0x58] sm:$0xff] }
 0xa7d   :  { %v1043_v29 = vadd.f32 %v1042_v27, %v1041_v28  ;;  %v1349_v27 = vld [vmem:[%s2335_s6 + $0x50] sm:$0xff]  ;;  %v1348_v28 = vld [vmem:[%s2335_s6 + $0x48] sm:$0xff] }
 0xa7e   :  { %v1040_v34 = vpop.permute.xlu0 %1039 }
 0xa7f   :  { %1831 = vtanh.f32 %v1043_v29  ;;  %v1050_v30 = vsub.f32 %v1043_v29, %v956_v8 }
 0xa81   :  { %v1051_v31 = vmul.f32 %v1050_v30, %v1046_v61 }
 0xa83   :  { %v1052_v32 = vadd.f32 %v1051_v31, %v956_v8  ;;  %v1346_v31 = vld [vmem:[%s2335_s6 + $0x38] sm:$0xff] }
 0xa8c   :  { %v1832_v33 = vpop.eup %1831 }
 0xa8d   :  { %v1045_v35 = vmul.f32 %v1832_v33, %v1040_v34  ;;  %v1345_v33 = vld [vmem:[%s2335_s6 + $0x30] sm:$0xff]  ;;  %v1344_v34 = vld [vmem:[%s2335_s6 + $0x28] sm:$0xff] }
 0xa8f   :  { %v1047_v36 = vsub.f32 %v1045_v35, %v953_v15  ;;  %v1343_v35 = vld [vmem:[%s2335_s6 + $0x20] sm:$0xff] }
 0xa91   :  { %v1048_v37 = vmul.f32 %v1047_v36, %v1046_v61  ;;  %v1347_v61 = vld [vmem:[%s2335_s6 + $0x40] sm:$0xff]  ;;  %v1342_v36 = vld [vmem:[%s2335_s6 + $0x18] sm:$0xff] }
 0xa93   :  { %v1049_v38 = vadd.f32 %v1048_v37, %v953_v15  ;;  %v1341_v37 = vld [vmem:[%s2335_s6 + $0x10] sm:$0xff] }
 0xa95   :  { %1736 = vmatmul.mubr.msk.f32.vlgmr.msra.gmra.mxu1 %vm223_vm2, %v1049_v38 }
 0xa96   :  { %1750 = vmatpush3.msra.mxu1 %v1998_v19  ;;  %1757 = vmatprep.mubr.msk.f32.mxu1 %vm1873_vm1, %v1872_v12 }
 0xa97   :  { %1751 = vmatprep.subr.mxu1 %v1872_v12 }
 0xa98   :  { %1752 = vmatpush3.msra.mxu1 %v2005_v20 }
 0xa99   :  { %1753 = vmatprep.subr.mxu1 %v1872_v12 }
 0xa9a   :  { %1754 = vmatpush3.msra.mxu1 %v2012_v21 }
 0xa9b   :  { %1755 = vmatprep.subr.mxu1 %v1872_v12 }
 0xa9c   :  { %1756 = vmatpush3.msra.mxu1 %v2019_v22  ;;  %v1142_v22 = vld [vmem:[%s2330_s1 + $0x38] sm:$0xff] }
 0xb55   :  { %v1123_v39 = vpop.f32.mrf.mxu1 }
 0xb56   :  { %v1127_v40 = vadd.f32 %v2090_v60, %v1123_v39  ;;  %v1339_v39 = vld [vmem:[%s2335_s6] sm:$0xff] }
 0xb57   :  { %v1737_v41 = vpop.f32.mrf.mxu1 }
 0xb58   :  { %1833 = vtanh.f32 %v1127_v40 }
 0xb65   :  { %v1834_v19 = vpop.eup %1833 }
 0xb66   :  { %1133 = vrot.lane.b32.xlu0 %v1834_v19, %s1874_s5  ;;  %v1129_v42 = vmul.f32 0.5, %v1834_v19 }
 0xb68   :  { %v1130_v59 = vadd.f32 0.5, %v1129_v42 }
 0xb6a   :  { %1131 = vrot.lane.b32.xlu1 %v1130_v59, %s1875_s16 }
 0xb6e   :  { %1135 = vrot.lane.b32.xlu1 %v1130_v59, %s1876_s17 }
 0xbd8   :  { %v1134_v20 = vpop.permute.xlu0 %1133 }
 0xbd9   :  { %v1138_v43 = vmul.f32 %v1134_v20, %v1130_v59 }
 0xbdc   :  { %v1132_v21 = vpop.permute.xlu1 %1131 }
 0xbdd   :  { %v1137_v44 = vmul.f32 %v1132_v21, %v1052_v32 }
 0xbdf   :  { %v1139_v45 = vadd.f32 %v1138_v43, %v1137_v44  ;;  %v1334_v44 = vld [vmem:[%s2330_s1 + $0x48] sm:$0xff] }
 0xbe0   :  { %v1136_v49 = vpop.permute.xlu1 %1135 }
 0xbe1   :  { %1835 = vtanh.f32 %v1139_v45  ;;  %v1146_v60 = vsub.f32 %v1139_v45, %v1052_v32 }
 0xbe3   :  { %v1147_v46 = vmul.f32 %v1146_v60, %v1142_v22  ;;  %v1527_v60 = vld [vmem:[%s2336_s7] ss:$0 sm:$0xff] }
 0xbe5   :  { %v1148_v47 = vadd.f32 %v1147_v46, %v1052_v32 }
 0xbee   :  { %v1836_v48 = vpop.eup %1835 }
 0xbef   :  { %v1141_v50 = vmul.f32 %v1836_v48, %v1136_v49  ;;  %v1528_v49 = vld [vmem:[%s2337_s8] ss:$0 sm:$0xff] }
 0xbf1   :  { %v1143_v51 = vsub.f32 %v1141_v50, %v1049_v38 }
 0xbf3   :  { %v1144_v52 = vmul.f32 %v1143_v51, %v1142_v22 }
 0xbf5   :  { %v1145_v53 = vadd.f32 %v1144_v52, %v1049_v38  ;;  %v1340_v38 = vld [vmem:[%s2335_s6 + $0x8] sm:$0xff] }
 0xbf7   :  { %1747 = vmatmul.mubr.msk.f32.vlgmr.msra.gmra.mxu0 %vm223_vm2, %v1145_v53 }
 0xbf8   :  { %1792 = vmatprep.mubr.msk.f32.mxu0 %vm1873_vm1, %v1872_v12  ;;  %1761 = vmatpush3.msra.mxu0 %v1354_v17 }
 0xbf9   :  { %1762 = vmatprep.subr.mxu0 %v1872_v12 }
 0xbfa   :  { %1763 = vmatpush3.msra.mxu0 %v1353_v24 }
 0xbfb   :  { %1764 = vmatprep.subr.mxu0 %v1872_v12 }
 0xbfc   :  { %1765 = vmatpush3.msra.mxu0 %v1352_v25 }
 0xbfd   :  { %1766 = vmatprep.subr.mxu0 %v1872_v12 }
 0xcb7   :  { %v1219_v54 = vpop.f32.mrf.mxu0 }
 0xcb8   :  { %v1223_v55 = vadd.f32 %v1219_v54, %v2096_v63  ;;  %v1238_v63 = vld [vmem:[%s2330_s1 + $0x40] sm:$0xff]  ;;  %s1877_s1 = smov [#allocation4]  }
 0xcb9   :  { %v1748_v57 = vpop.f32.mrf.mxu0  ;;  %s1481_s7 = sshll.u32 %s1877_s1, 4  ;;  %s1482_s7 = int_to_ptr.vmem [resolvable:$true] %s1481_s7 }
 0xcba   :  { %1837 = vtanh.f32 %v1223_v55  ;;  %s1849_s25 = scalar_lea.vmem %s1482_s7, 128  ;;  %p1854_p1 = scmp.lt.s32.totalorder %s1482_s7, %s1482_s7 }
 0xcbb   :  { %p1850_p0 = scmp.ne.s32.totalorder %s1482_s7, %s1849_s25  ;;  %p1855_p2 = scmp.lt.s32.totalorder %s1849_s25, %s1849_s25 }
 0xcbd   :  { %p1856_p3 = por %p1855_p2, %p1854_p1 }
 0xcbf   :  { %p1857_p4 = pnand %p1856_p3, %p1850_p0 }
 0xcc7   :  { %v1838_v0 = vpop.eup %1837 }
 0xcc8   :  { %1229 = vrot.lane.b32.xlu1 %v1838_v0, %s1874_s5  ;;  %v1225_v1 = vmul.f32 0.5, %v1838_v0 }
 0xcca   :  { %v1226_v2 = vadd.f32 0.5, %v1225_v1 }
 0xccc   :  { %1227 = vrot.lane.b32.xlu0 %v1226_v2, %s1875_s16 }
 0xcd0   :  { %1231 = vrot.lane.b32.xlu0 %v1226_v2, %s1876_s17 }
 0xd3a   :  { %v1230_v3 = vpop.permute.xlu1 %1229 }
 0xd3b   :  { %v1234_v5 = vmul.f32 %v1230_v3, %v1226_v2 }
 0xd3e   :  { %v1228_v4 = vpop.permute.xlu0 %1227 }
 0xd3f   :  { %v1233_v58 = vmul.f32 %v1228_v4, %v1148_v47 }
 0xd41   :  { %v1235_v6 = vadd.f32 %v1234_v5, %v1233_v58 }
 0xd42   :  { %v1232_v11 = vpop.permute.xlu0 %1231 }
 0xd43   :  { %1839 = vtanh.f32 %v1235_v6  ;;  %v1242_v7 = vsub.f32 %v1235_v6, %v1148_v47 }
 0xd45   :  { %v1243_v8 = vmul.f32 %v1242_v7, %v1238_v63 }
 0xd47   :  { %v2238_v9 = vadd.f32 %v1243_v8, %v1148_v47 }
 0xd50   :  { %v1840_v10 = vpop.eup %1839 }
 0xd51   :  { %v1237_v13 = vmul.f32 %v1840_v10, %v1232_v11 }
 0xd53   :  { %v1239_v14 = vsub.f32 %v1237_v13, %v1145_v53 }
 0xd55   :  { %v1240_v15 = vmul.f32 %v1239_v14, %v1238_v63 }
 0xd57   :  { %v2240_v16 = vadd.f32 %v1240_v15, %v1145_v53  ;;  %v1529_v53 = vld [vmem:[#allocation3] ss:$0 sm:$0xff] }
 0xd59   :  { %1758 = vmatmul.mubr.msk.f32.vlgmr.msra.gmra.mxu1 %vm223_vm2, %v2240_v16 }
 0xe19   :  { %v1315_v18 = vpop.f32.mrf.mxu1 }
 0xe1a   :  { %v1319_v56 = vadd.f32 %v2094_v62, %v1315_v18  ;;  %v1351_v62 = vld [vmem:[%s2335_s6 + $0x60] sm:$0xff] }
 0xe1b   :  { %v1759_v23 = vpop.f32.mrf.mxu1  ;;  %1767 = vmatpush3.msra.mxu0 %v1351_v62 }
 0xe1c   :  { %1841 = vtanh.f32 %v1319_v56  ;;  %1768 = vmatprep.subr.mxu0 %v1872_v12 }
 0xe1d   :  { %1769 = vmatpush3.msra.mxu0 %v1350_v26 }
 0xe1e   :  { %1770 = vmatprep.subr.mxu0 %v1872_v12 }
 0xe1f   :  { %1771 = vmatpush3.msra.mxu0 %v1349_v27 }
 0xe20   :  { %1772 = vmatprep.subr.mxu0 %v1872_v12 }
 0xe21   :  { %1773 = vmatpush3.msra.mxu0 %v1348_v28 }
 0xe22   :  { %1774 = vmatprep.subr.mxu0 %v1872_v12 }
 0xe23   :  { %1775 = vmatpush3.msra.mxu0 %v1347_v61 }
 0xe24   :  { %1776 = vmatprep.subr.mxu0 %v1872_v12 }
 0xe25   :  { %1777 = vmatpush3.msra.mxu0 %v1346_v31 }
 0xe26   :  { %1778 = vmatprep.subr.mxu0 %v1872_v12 }
 0xe27   :  { %1779 = vmatpush3.msra.mxu0 %v1345_v33 }
 0xe28   :  { %1780 = vmatprep.subr.mxu0 %v1872_v12 }
 0xe29   :  { %v1842_v29 = vpop.eup %1841  ;;  %1781 = vmatpush3.msra.mxu0 %v1344_v34 }
 0xe2a   :  { %1325 = vrot.lane.b32.xlu0 %v1842_v29, %s1874_s5  ;;  %v1321_v30 = vmul.f32 0.5, %v1842_v29  ;;  %1782 = vmatprep.subr.mxu0 %v1872_v12 }
 0xe2b   :  { %1783 = vmatpush3.msra.mxu0 %v1343_v35 }
 0xe2c   :  { %v1322_v32 = vadd.f32 0.5, %v1321_v30  ;;  %1784 = vmatprep.subr.mxu0 %v1872_v12 }
 0xe2d   :  { %1785 = vmatpush3.msra.mxu0 %v1342_v36 }
 0xe2e   :  { %1323 = vrot.lane.b32.xlu1 %v1322_v32, %s1875_s16  ;;  %1786 = vmatprep.subr.mxu0 %v1872_v12 }
 0xe2f   :  { %1787 = vmatpush3.msra.mxu0 %v1341_v37 }
 0xe30   :  { %1788 = vmatprep.subr.mxu0 %v1872_v12 }
 0xe31   :  { %1789 = vmatpush3.msra.mxu0 %v1340_v38 }
 0xe32   :  { %1327 = vrot.lane.b32.xlu1 %v1322_v32, %s1876_s17  ;;  %1790 = vmatprep.subr.mxu0 %v1872_v12 }
 0xe33   :  { %1791 = vmatpush3.msra.mxu0 %v1339_v39 }
 0xe9c   :  { %v1326_v40 = vpop.permute.xlu0 %1325 }
 0xe9d   :  { %v1330_v19 = vmul.f32 %v1326_v40, %v1322_v32 }
 0xea0   :  { %v1324_v41 = vpop.permute.xlu1 %1323 }
 0xea1   :  { %v1329_v42 = vmul.f32 %v1324_v41, %v2238_v9 }
 0xea3   :  { %v1331_v59 = vadd.f32 %v1330_v19, %v1329_v42 }
 0xea4   :  { %v1328_v21 = vpop.permute.xlu1 %1327 }
 0xea5   :  { %1843 = vtanh.f32 %v1331_v59 }
 0xeb2   :  { %v1844_v20 = vpop.eup %1843 }
 0xeb3   :  { %v1333_v43 = vmul.f32 %v1844_v20, %v1328_v21 }
 0xeb5   :  { %v1335_v12 = vsub.f32 %v1333_v43, %v2240_v16 }
 0xeb7   :  { %v1336_v45 = vmul.f32 %v1335_v12, %v1334_v44 }
 0xeb9   :  { %v1337_v22 = vadd.f32 %v1336_v45, %v2240_v16 }
 0xebb   :  { %1338 = vst [vmem:[#allocation4] sm:$0xff] %v1337_v22  ;;  %1793 = vmatmul.mubr.f32.vlgmr.msra.gmra.mxu0 %v1337_v22 }
 0xf7b   :  { %v1428_v46 = vpop.f32.mrf.mxu0 }
 0xf7c   :  { %v1429_v47 = vadd.f32 %v1527_v60, %v1428_v46 }
 0xf7d   :  { %v1794_v48 = vpop.f32.mrf.mxu0 }
 0xf7e   :  { %v1432_v50 = vmax.f32 %v1429_v47, 0.0 }
 0xf80   :  { %v1440_v51 = vmul.f32 %v1528_v49, %v1432_v50 }
 0xf82   :  { %v1442_v52 = vsel %vm1441_vm13, %v1440_v51, 0.0 }
 0xf83   :  { %1443 = vadd.xlane.f32.xlu0 %v1442_v52 }
0x100c   :  { %v1444_v54 = vpop.xlane.xlu0 %1443 }
0x100d   :  { %v1452_v55 = vadd.f32 %v1529_v53, %v1444_v54 }
0x100f   :  { %v1453_v57 = vand.u32 2147483647, %v1452_v55 }
0x1011   :  { %v1454_v0 = vsub.f32 0.0, %v1453_v57 }
0x1013   :  { %v1455_v1 = vmul.f32 1.442695, %v1454_v0 }
0x1015   :  { %1845 = vpow2.f32 %v1455_v1 }
0x1022   :  { %v1846_v2 = vpop.eup %1845 }
0x1023   :  { %v1457_v3 = vadd.f32 1.0, %v1846_v2 }
0x1025   :  { %1847 = vlog2.f32 %v1457_v3 }
0x1026   :  { %1860 = shalt.err (!%p1857_p4)
}
0x1027   :  { %1484 = dma.vmem_to_hbm [thread:$0]  %s1482_s7, 128, %s2339_s10, [#allocation5]   ;;  %v1460_v4 = vsub.f32 0.0, %v1452_v55  ;;  %v1463_v6 = vmax.f32 %v1452_v55, 0.0  ;;  %vm1471_vm14 = vcmask 7168   ;;  %vm1473_vm15 = vcmask 15360  }
0x1028   :  { %s1878_s26 = smov 1  }
0x1029   :  { %v1461_v58 = vmax.f32 %v1460_v4, 0.0 }
0x1032   :  { %v1848_v5 = vpop.eup %1847 }
0x1033   :  { %v1459_v63 = vmul.f32 0.6931472, %v1848_v5 }
0x1035   :  { %v1464_v7 = vadd.f32 %v1463_v6, %v1459_v63  ;;  %v1462_v8 = vadd.f32 %v1461_v58, %v1459_v63 }
0x1037   :  { %v1466_v9 = vsub.f32 0.0, %v1464_v7  ;;  %v1465_v10 = vsub.f32 0.0, %v1462_v8 }
0x1039   :  { %1468 = vrot.lane.b32.xlu1 %v1466_v9, %s1878_s26 }
0x10ab   :  { %v1469_v11 = vpop.permute.xlu1 %1468 }
0x10ac   :  { %v1472_v13 = vsel %vm1471_vm14, %v1465_v10, %v1469_v11 }
0x10ad   :  { %1474 = vst.msk [vmem:[%s2340_s11] sm:$0xff] %vm1473_vm15, %v1472_v13 }
0x10ae   :  { %1869 = dma.done.wait [#allocation5], 128  }
0x10af   :  { %1870 = vsyncadd [#allocation5], 4294967168 }
0x10b0   :  { %1492 = vsyncpa [#allocation5], 1 }

</bundles_post_ra>
